<compile_context>
chip_gen: v7x
topology: tpu7x:2x2x1
jax: 0.10.0
libtpu: 0.0.40
codegen_flags: <defaults>
</compile_context>

<pallas_src>
import functools

import jax
import jax.numpy as jnp
from jax import lax
from jax.experimental import pallas as pl
from jax.experimental.pallas import tpu as pltpu

EPS = 1e-5

ATOM_FEATURE_DIMS = [10, 4, 6, 6, 5, 3, 3, 2, 2]   # 9 synthetic atom features
BOND_FEATURE_DIMS = [5, 6, 2]                      # 3 synthetic bond features
NBOND = sum(BOND_FEATURE_DIMS)                     # 13
NBOND_PAD = 16                                     # concatenated bond table rows (8-mult)

# Scoped VMEM budget: > v5e's 16 MiB / v6e-v7x's 32 MiB defaults, < v7x's 64 MiB physical.
VMEM_LIMIT = 48 * 1024 * 1024


def _round_up(x, m):
    return (x + m - 1) // m * m


def _params(*semantics):
    return pltpu.CompilerParams(dimension_semantics=tuple(semantics),
                                vmem_limit_bytes=VMEM_LIMIT)


def _pad_rows(a, multiple):
    n = a.shape[0]
    pad = (-n) % multiple
    if pad == 0:
        return a
    return jnp.concatenate([a, jnp.zeros((pad,) + a.shape[1:], a.dtype)], axis=0)


# --------------------------------- Pallas kernels ---------------------------------

def linear_kernel(h_ref, w_ref, b_ref, o_ref):
    # bf16 x bf16 -> f32 on the MXU, bias in f32, bf16 output (halves HBM traffic).
    acc = jnp.dot(h_ref[...], w_ref[...], preferred_element_type=jnp.float32)
    o_ref[...] = (acc + b_ref[...]).astype(o_ref.dtype)


def linear(h_bf16, w_bf16, b, tile_n):
    n, d = h_bf16.shape
    return pl.pallas_call(
        linear_kernel,
        out_shape=jax.ShapeDtypeStruct((n, d), jnp.bfloat16),
        grid=(n // tile_n,),
        in_specs=[
            pl.BlockSpec((tile_n, d), lambda i: (i, 0)),
            pl.BlockSpec((d, d), lambda i: (0, 0)),      # weights resident, no re-DMA
            pl.BlockSpec((1, d), lambda i: (0, 0)),      # bias resident
        ],
        out_specs=pl.BlockSpec((tile_n, d), lambda i: (i, 0)),
        compiler_params=_params("parallel"),
    )(h_bf16, w_bf16, b)


def gcn_edge_kernel(tb_ref, ts_ref, xj_ref, oh_ref, btab_ref, norm_ref, cloc_ref,
                    aggr_ref, acc_ref, *, tile_n, tile_e):
    # Fused: bond-encode (one-hot @ table) + message (norm * relu(x_j + ee)) + segment
    # scatter-add into the destination node block (norm folded into the scatter matmul).
    t = pl.program_id(0)

    @pl.when(ts_ref[t] == 1)                             # first edge tile of this block
    def _():
        acc_ref[...] = jnp.zeros_like(acc_ref)

    ee = jnp.dot(oh_ref[...].astype(jnp.float32), btab_ref[...],
                 preferred_element_type=jnp.float32)                     # (tile_e, d)
    m = jnp.maximum(xj_ref[...].astype(jnp.float32) + ee, 0.0)           # (tile_e, d)

    n_iota = lax.broadcasted_iota(jnp.int32, (tile_n, tile_e), 0)
    w = jnp.where(cloc_ref[...] == n_iota, norm_ref[...], 0.0)           # (tile_n, tile_e)
    acc_ref[...] += jnp.dot(w, m, preferred_element_type=jnp.float32)    # MXU scatter-add
    aggr_ref[...] = acc_ref[...]       # full write every step -> robust to output buffering


def gcn_edge_aggregate(x_j, oh, btab, norm_row, cloc_row, tile_block, tile_is_start,
                       n_pad, tile_n, tile_e):
    e2, d = x_j.shape
    num_tiles = e2 // tile_e
    kern = functools.partial(gcn_edge_kernel, tile_n=tile_n, tile_e=tile_e)
    grid_spec = pltpu.PrefetchScalarGridSpec(
        num_scalar_prefetch=2,                                    # tile->block schedule
        grid=(num_tiles,),
        in_specs=[
            pl.BlockSpec((tile_e, d), lambda t, tb, ts: (t, 0)),          # x_j (bf16)
            pl.BlockSpec((tile_e, NBOND_PAD), lambda t, tb, ts: (t, 0)),  # bond one-hot
            pl.BlockSpec((NBOND_PAD, d), lambda t, tb, ts: (0, 0)),       # table resident
            pl.BlockSpec((1, tile_e), lambda t, tb, ts: (0, t)),          # per-edge norm
            pl.BlockSpec((1, tile_e), lambda t, tb, ts: (0, t)),          # local dest idx
        ],
        out_specs=pl.BlockSpec((tile_n, d), lambda t, tb, ts: (tb[t], 0)),
        scratch_shapes=[pltpu.VMEM((tile_n, d), jnp.float32)],            # f32 accumulator
    )
    return pl.pallas_call(
        kern,
        out_shape=jax.ShapeDtypeStruct((n_pad, d), jnp.float32),
        grid_spec=grid_spec,
        compiler_params=_params("arbitrary"),      # accumulation across edge tiles
    )(tile_block, tile_is_start, x_j, oh, btab, norm_row, cloc_row)


def combine_stats_kernel(aggr_ref, xlin_ref, root_ref, dinv_ref,
                         hpre_ref, psum_ref, pssq_ref, *, n_true, tile_n):
    # h_pre = aggr + relu(x_lin + root)/deg; per-tile BN partial sums (parallel-safe).
    hp = aggr_ref[...] + (
        jnp.maximum(xlin_ref[...].astype(jnp.float32) + root_ref[...], 0.0) * dinv_ref[...])
    hpre_ref[...] = hp.astype(hpre_ref.dtype)
    rid = pl.program_id(0) * tile_n + lax.broadcasted_iota(jnp.int32, (tile_n, 1), 0)
    hm = jnp.where(rid < n_true, hp, 0.0)                 # mask padded rows out of stats
    psum_ref[...] = jnp.sum(hm, axis=0, keepdims=True)[None]
    pssq_ref[...] = jnp.sum(hm * hm, axis=0, keepdims=True)[None]


def combine_stats(aggr, x_lin, root, deg_inv_col, n_true, tile_n):
    n_pad, d = aggr.shape
    num_tiles = n_pad // tile_n
    kern = functools.partial(combine_stats_kernel, n_true=n_true, tile_n=tile_n)
    return pl.pallas_call(
        kern,
        out_shape=(
            jax.ShapeDtypeStruct((n_pad, d), jnp.bfloat16),        # h_pre
            jax.ShapeDtypeStruct((num_tiles, 1, d), jnp.float32),  # per-tile sum
            jax.ShapeDtypeStruct((num_tiles, 1, d), jnp.float32),  # per-tile sum-of-sq
        ),
        grid=(num_tiles,),
        in_specs=[
            pl.BlockSpec((tile_n, d), lambda i: (i, 0)),
            pl.BlockSpec((tile_n, d), lambda i: (i, 0)),
            pl.BlockSpec((1, d), lambda i: (0, 0)),
            pl.BlockSpec((tile_n, 1), lambda i: (i, 0)),
        ],
        out_specs=(
            pl.BlockSpec((tile_n, d), lambda i: (i, 0)),
            pl.BlockSpec((1, 1, d), lambda i: (i, 0, 0)),
            pl.BlockSpec((1, 1, d), lambda i: (i, 0, 0)),
        ),
        compiler_params=_params("parallel"),
    )(aggr, x_lin, root, deg_inv_col)


def bn_apply_kernel(hpre_ref, scale_ref, shift_ref, resin_ref, h_ref, resout_ref,
                    *, apply_relu):
    y = hpre_ref[...].astype(jnp.float32) * scale_ref[...] + shift_ref[...]
    if apply_relu:
        y = jnp.maximum(y, 0.0)
    # TODO(synk): F.dropout omitted (eval-mode identity); stochastic op not reproduced.
    h_ref[...] = y.astype(h_ref.dtype)                    # bf16 next-layer activations
    resout_ref[...] = resin_ref[...] + y                  # f32 running residual (in place)


def bn_apply_residual(h_pre, scale_row, shift_row, res_in, apply_relu, tile_n):
    n_pad, d = h_pre.shape
    kern = functools.partial(bn_apply_kernel, apply_relu=apply_relu)
    return pl.pallas_call(
        kern,
        out_shape=(
            jax.ShapeDtypeStruct((n_pad, d), jnp.bfloat16),
            jax.ShapeDtypeStruct((n_pad, d), jnp.float32),
        ),
        grid=(n_pad // tile_n,),
        in_specs=[
            pl.BlockSpec((tile_n, d), lambda i: (i, 0)),
            pl.BlockSpec((1, d), lambda i: (0, 0)),
            pl.BlockSpec((1, d), lambda i: (0, 0)),
            pl.BlockSpec((tile_n, d), lambda i: (i, 0)),
        ],
        out_specs=(
            pl.BlockSpec((tile_n, d), lambda i: (i, 0)),
            pl.BlockSpec((tile_n, d), lambda i: (i, 0)),
        ),
        input_output_aliases={3: 1},                       # residual updated in place
        compiler_params=_params("parallel"),
    )(h_pre, scale_row, shift_row, res_in)


# ------------------- Edge schedule (once per forward, layer-invariant) -------------------

def _build_edge_schedule(row, col, norm, edge_attr, n_pad, tile_n, tile_e):
    """Sort edges by destination, pad each destination node-block's edge segment to a whole
    number of edge tiles, and build the tile->block schedule for the fused edge kernel."""
    e_true = row.shape[0]
    num_blocks = n_pad // tile_n
    e2 = _round_up(e_true, tile_e) + num_blocks * tile_e     # static capacity
    num_tiles = e2 // tile_e

    # Layer-invariant bond-feature one-hot (rows of the concatenated bond table).
    offs, o = [], 0
    for v in BOND_FEATURE_DIMS:
        offs.append(o)
        o += v
    offs = jnp.array(offs, jnp.int32)
    oh = jax.nn.one_hot(edge_attr.astype(jnp.int32) + offs[None, :], NBOND_PAD,
                        dtype=jnp.bfloat16).sum(axis=1)      # [E, 16]

    order = jnp.argsort(col)
    row_s, col_s, norm_s, oh_s = row[order], col[order], norm[order], oh[order]

    blk = col_s // tile_n
    cnt = jnp.bincount(blk, length=num_blocks).astype(jnp.int32)
    start = jnp.cumsum(cnt) - cnt                             # exclusive prefix sum
    pcnt = jnp.maximum(((cnt + tile_e - 1) // tile_e) * tile_e, tile_e)  # >=1 tile / block
    pstart = jnp.cumsum(pcnt) - pcnt
    pos = pstart[blk] + (jnp.arange(e_true, dtype=jnp.int32) - start[blk])

    # Dummy slots keep norm = 0 -> they contribute exactly zero in the kernel.
    row2 = jnp.zeros((e2,), jnp.int32).at[pos].set(row_s)
    cloc = jnp.zeros((e2,), jnp.int32).at[pos].set(col_s - blk * tile_n)
    norm2 = jnp.zeros((e2,), jnp.float32).at[pos].set(norm_s)
    oh2 = jnp.zeros((e2, NBOND_PAD), jnp.bfloat16).at[pos].set(oh_s)

    tile_start_idx = jnp.arange(num_tiles, dtype=jnp.int32) * tile_e
    tile_block = (jnp.searchsorted(pstart, tile_start_idx, side="right") - 1).astype(jnp.int32)
    tile_is_start = (tile_start_idx == pstart[tile_block]).astype(jnp.int32)

    return row2, cloc[None, :], norm2[None, :], oh2, tile_block, tile_is_start


# ------------------- Parameter init (deterministic, synthetic) -------------------

def init_params(key, num_layer, emb_dim):
    params = {}
    k_atom, *k_layers = jax.random.split(key, 1 + num_layer)

    params["atom_emb"] = [
        0.1 * jax.random.normal(jax.random.fold_in(k_atom, k), (v, emb_dim), jnp.float32)
        for k, v in enumerate(ATOM_FEATURE_DIMS)
    ]

    layers = []
    for lk in k_layers:
        w = (jax.random.normal(jax.random.fold_in(lk, 0), (emb_dim, emb_dim), jnp.float32)
             / jnp.sqrt(float(emb_dim))).astype(jnp.bfloat16)     # stored as torch W^T, bf16
        b = jnp.zeros((1, emb_dim), jnp.float32)
        root = 0.1 * jax.random.normal(jax.random.fold_in(lk, 1), (1, emb_dim), jnp.float32)
        bond_emb = [
            0.1 * jax.random.normal(jax.random.fold_in(lk, 10 + k), (v, emb_dim), jnp.float32)
            for k, v in enumerate(BOND_FEATURE_DIMS)
        ]
        gamma = jnp.ones((1, emb_dim), jnp.float32)
        beta = jnp.zeros((1, emb_dim), jnp.float32)
        layers.append(dict(w=w, b=b, root=root, bond_emb=bond_emb, gamma=gamma, beta=beta))
    params["layers"] = layers
    return params


# ---------------------- Forward pass (mirrors GNN_node.forward) ----------------------

def gnn_node_forward(params, x, edge_index, edge_attr, tile_n=128, tile_e=128):
    # For production OGB-scale graphs raise tile_n/tile_e to 512-1024 (VMEM_LIMIT is set).
    n_true = x.shape[0]
    d = params["layers"][0]["b"].shape[1]
    num_layer = len(params["layers"])

    # AtomEncoder: tiny embedding-table gathers stay in JAX.
    h0 = jnp.zeros((n_true, d), jnp.float32)
    for k, emb in enumerate(params["atom_emb"]):
        h0 = h0 + emb[x[:, k]]

    row = edge_index[0].astype(jnp.int32)
    col = edge_index[1].astype(jnp.int32)

    # Degree / norm / edge schedule: edge-structure-only -> hoisted out of the layer loop.
    deg = jnp.zeros((n_true,), jnp.float32).at[row].add(1.0) + 1.0
    dis = lax.rsqrt(deg)                                          # deg >= 1, never inf
    norm = dis[row] * dis[col]

    n_pad = _round_up(n_true, tile_n)
    row2, cloc_row, norm_row, oh2, tile_block, tile_is_start = _build_edge_schedule(
        row, col, norm, edge_attr, n_pad, tile_n, tile_e)

    h_prev = _pad_rows(h0, tile_n).astype(jnp.bfloat16)           # bf16 layer input
    res = _pad_rows(h0, tile_n)                                   # f32 running h_list sum
    dinv_col = _pad_rows((1.0 / deg)[:, None], tile_n)            # padded nodes -> 0

    for layer in range(num_layer):
        p = params["layers"][layer]

        # GCNConv linear on the MXU (bf16 x bf16 -> f32 -> bf16).
        x_lin = linear(h_prev, p["w"], p["b"], tile_n)            # [n_pad, d] bf16

        # TODO(synk): x_lin[row] gather left to XLA (bf16 rows); a production kernel would
        # fuse it via a CSR two-level DMA pipeline (edges here are sorted by destination).
        x_j = x_lin[row2]                                         # [e2, d] bf16

        # Concatenated (13 -> padded 16 rows) bond table, resident in VMEM in the kernel.
        btab = jnp.concatenate(p["bond_emb"], axis=0)
        btab = jnp.concatenate([btab, jnp.zeros((NBOND_PAD - NBOND, d), jnp.float32)], 0)

        # Fused bond-encode + message + segment scatter-add (f32 accumulation on MXU).
        aggr = gcn_edge_aggregate(x_j, oh2, btab, norm_row, cloc_row,
                                  tile_block, tile_is_start, n_pad, tile_n, tile_e)

        # Pass 1: combine + per-tile BN partial statistics (parallel across TensorCores).
        h_pre, psum, pssq = combine_stats(aggr, x_lin, p["root"], dinv_col, n_true, tile_n)

        # Tiny (1, d) BN math (training-mode batch stats, biased variance).
        ssum = jnp.sum(psum, axis=0)
        ssq = jnp.sum(pssq, axis=0)
        mean = ssum / n_true
        var = jnp.maximum(ssq / n_true - mean * mean, 0.0)
        scale = p["gamma"] * lax.rsqrt(var + EPS)
        shift = p["beta"] - mean * scale

        # Pass 2: BN apply (+ReLU for non-last layers) + in-place residual accumulate.
        is_last = layer == num_layer - 1
        h_prev, res = bn_apply_residual(h_pre, scale, shift, res,
                                        apply_relu=not is_last, tile_n=tile_n)

    return res[:n_true]


# ------------------------------------ Example run ------------------------------------

if __name__ == "__main__":
    key = jax.random.PRNGKey(0)
    num_layer, emb_dim = 2, 128
    N, E = 256, 512

    pkey, xkey, ekey, akey = jax.random.split(key, 4)
    params = init_params(pkey, num_layer, emb_dim)

    x = jnp.stack(
        [jax.random.randint(jax.random.fold_in(xkey, k), (N,), 0, v)
         for k, v in enumerate(ATOM_FEATURE_DIMS)], axis=1)              # [N, 9] int32
    edge_index = jax.random.randint(ekey, (2, E), 0, N)                  # [2, E] int32
    edge_attr = jnp.stack(
        [jax.random.randint(jax.random.fold_in(akey, k), (E,), 0, v)
         for k, v in enumerate(BOND_FEATURE_DIMS)], axis=1)              # [E, 3] int32

    fwd = jax.jit(gnn_node_forward)
    out = fwd(params, x, edge_index, edge_attr)
    jax.block_until_ready(out)
    assert out.shape == (N, emb_dim) and out.dtype == jnp.float32
    assert bool(jnp.all(jnp.isfinite(out)))
    print("KERNEL_OK")
</pallas_src>

<mosaic_0001>
module attributes {stable_mosaic.version = 11 : i64} {
  func.func private @main(%arg0: i32) attributes {dimension_semantics = [#tpu.dimension_semantics<core_parallel>], iteration_bounds = array<i64: 2>, tpu.core_type = #tpu.core_type<sc_scalar_subcore>, window_params = []} {
    return
  }
}

module attributes {stable_mosaic.version = 11 : i64} {
  func.func private @main(%arg0: i32) attributes {dimension_semantics = [#tpu.dimension_semantics<core_parallel>], iteration_bounds = array<i64: 2>, tpu.core_type = #tpu.core_type<sc_scalar_subcore>, window_params = []} {
    return
  }
}

module attributes {stable_mosaic.version = 11 : i64} {
  func.func @linear_kernel(%arg0: i32, %arg1: memref<128x128xbf16, #tpu.memory_space<vmem>>, %arg2: memref<128x128xbf16, #tpu.memory_space<vmem>>, %arg3: memref<1x128xf32, #tpu.memory_space<vmem>>, %arg4: memref<128x128xbf16, #tpu.memory_space<vmem>>) attributes {dimension_semantics = [#tpu.dimension_semantics<parallel>], iteration_bounds = array<i64: 2>, scalar_prefetch = 0 : i64, scratch_operands = 0 : i64, tpu.core_type = #tpu.core_type<tc>, window_params = [{transform_indices = @transform_0, window_bounds = array<i64: 128, 128>}, {pipeline_mode = #tpu.pipeline_mode<synchronous>, transform_indices = @transform_1, window_bounds = array<i64: 128, 128>}, {pipeline_mode = #tpu.pipeline_mode<synchronous>, transform_indices = @transform_2, window_bounds = array<i64: 1, 128>}, {transform_indices = @transform_3, window_bounds = array<i64: 128, 128>}]} {
    %c0 = arith.constant 0 : index
    %c0_0 = arith.constant 0 : index
    %0 = vector.load %arg1[%c0, %c0_0] : memref<128x128xbf16, #tpu.memory_space<vmem>>, vector<128x128xbf16>
    %c0_1 = arith.constant 0 : index
    %c0_2 = arith.constant 0 : index
    %1 = vector.load %arg2[%c0_1, %c0_2] : memref<128x128xbf16, #tpu.memory_space<vmem>>, vector<128x128xbf16>
    %cst = arith.constant dense<0.000000e+00> : vector<128x128xf32>
    %2 = tpu.matmul %0, %1, %cst {dimension_numbers = #tpu.dot_dimension_numbers<[1], [0], [0], [1], [0, 0, 1, 1], [], []>} : vector<128x128xbf16>, vector<128x128xbf16>, vector<128x128xf32> -> vector<128x128xf32>
    %c0_3 = arith.constant 0 : index
    %c0_4 = arith.constant 0 : index
    %3 = vector.load %arg3[%c0_3, %c0_4] : memref<1x128xf32, #tpu.memory_space<vmem>>, vector<1x128xf32>
    %4 = vector.broadcast %3 : vector<1x128xf32> to vector<128x128xf32>
    %5 = arith.addf %2, %4 : vector<128x128xf32>
    %6 = arith.truncf %5 : vector<128x128xf32> to vector<128x128xbf16>
    %c0_5 = arith.constant 0 : index
    %c0_6 = arith.constant 0 : index
    %7 = vector.load %arg4[%c0_5, %c0_6] : memref<128x128xbf16, #tpu.memory_space<vmem>>, vector<128x128xbf16>
    tpu.vector_store %arg4[%c0_5, %c0_6], %6 {strides = array<i32>} : memref<128x128xbf16, #tpu.memory_space<vmem>>, vector<128x128xbf16>,
    return
  }
  func.func @transform_0(%arg0: i32) -> (i32, i32) {
    %c0_i32 = arith.constant 0 : i32
    %c0_i32_0 = arith.constant 0 : i32
    return %arg0, %c0_i32 : i32, i32
  }
  func.func @transform_1(%arg0: i32) -> (i32, i32) {
    %c0_i32 = arith.constant 0 : i32
    %c0_i32_0 = arith.constant 0 : i32
    %c0_i32_1 = arith.constant 0 : i32
    return %c0_i32, %c0_i32_0 : i32, i32
  }
  func.func @transform_2(%arg0: i32) -> (i32, i32) {
    %c0_i32 = arith.constant 0 : i32
    %c0_i32_0 = arith.constant 0 : i32
    %c0_i32_1 = arith.constant 0 : i32
    return %c0_i32, %c0_i32_0 : i32, i32
  }
  func.func @transform_3(%arg0: i32) -> (i32, i32) {
    %c0_i32 = arith.constant 0 : i32
    %c0_i32_0 = arith.constant 0 : i32
    return %arg0, %c0_i32 : i32, i32
  }
}

module attributes {stable_mosaic.version = 11 : i64} {
  func.func @gcn_edge_kernel(%arg0: i32, %arg1: memref<6xi32, #tpu.memory_space<smem>>, %arg2: memref<6xi32, #tpu.memory_space<smem>>, %arg3: memref<128x128xbf16, #tpu.memory_space<vmem>>, %arg4: memref<128x16xbf16, #tpu.memory_space<vmem>>, %arg5: memref<16x128xf32, #tpu.memory_space<vmem>>, %arg6: memref<1x128xf32, #tpu.memory_space<vmem>>, %arg7: memref<1x128xi32, #tpu.memory_space<vmem>>, %arg8: memref<128x128xf32, #tpu.memory_space<vmem>>, %arg9: memref<128x128xf32, #tpu.memory_space<vmem>>) attributes {dimension_semantics = [#tpu.dimension_semantics<arbitrary>], iteration_bounds = array<i64: 6>, scalar_prefetch = 2 : i64, scratch_operands = 1 : i64, tpu.core_type = #tpu.core_type<tc>, window_params = [{transform_indices = @transform_0, window_bounds = array<i64: 128, 128>}, {transform_indices = @transform_1, window_bounds = array<i64: 128, 16>}, {pipeline_mode = #tpu.pipeline_mode<synchronous>, transform_indices = @transform_2, window_bounds = array<i64: 16, 128>}, {transform_indices = @transform_3, window_bounds = array<i64: 1, 128>}, {transform_indices = @transform_4, window_bounds = array<i64: 1, 128>}, {transform_indices = @transform_5, window_bounds = array<i64: 128, 128>}]} {
    %0 = arith.index_cast %arg0 : i32 to index
    %1 = memref.load %arg2[%0] : memref<6xi32, #tpu.memory_space<smem>>
    %c1_i32 = arith.constant 1 : i32
    %2 = arith.cmpi eq, %1, %c1_i32 : i32
    %3 = arith.extui %2 : i1 to i32
    %c0_i32 = arith.constant 0 : i32
    %4 = arith.cmpi ne, %3, %c0_i32 : i32
    scf.if %4 {
      %cst_20 = arith.constant 0.000000e+00 : f32
      %29 = vector.broadcast %cst_20 : f32 to vector<128x128xf32>
      %c0_21 = arith.constant 0 : index
      %c0_22 = arith.constant 0 : index
      %30 = vector.load %arg9[%c0_21, %c0_22] : memref<128x128xf32, #tpu.memory_space<vmem>>, vector<128x128xf32>
      tpu.vector_store %arg9[%c0_21, %c0_22], %29 {strides = array<i32>} : memref<128x128xf32, #tpu.memory_space<vmem>>, vector<128x128xf32>,
    } else {
    }
    %c0 = arith.constant 0 : index
    %c0_0 = arith.constant 0 : index
    %5 = vector.load %arg4[%c0, %c0_0] : memref<128x16xbf16, #tpu.memory_space<vmem>>, vector<128x16xbf16>
    %6 = arith.extf %5 : vector<128x16xbf16> to vector<128x16xf32>
    %c0_1 = arith.constant 0 : index
    %c0_2 = arith.constant 0 : index
    %7 = vector.load %arg5[%c0_1, %c0_2] : memref<16x128xf32, #tpu.memory_space<vmem>>, vector<16x128xf32>
    %cst = arith.constant dense<0.000000e+00> : vector<128x128xf32>
    %8 = tpu.matmul %6, %7, %cst {dimension_numbers = #tpu.dot_dimension_numbers<[1], [0], [0], [1], [0, 0, 1, 1], [], []>} : vector<128x16xf32>, vector<16x128xf32>, vector<128x128xf32> -> vector<128x128xf32>
    %c0_3 = arith.constant 0 : index
    %c0_4 = arith.constant 0 : index
    %9 = vector.load %arg3[%c0_3, %c0_4] : memref<128x128xbf16, #tpu.memory_space<vmem>>, vector<128x128xbf16>
    %10 = arith.extf %9 : vector<128x128xbf16> to vector<128x128xf32>
    %11 = arith.addf %10, %8 : vector<128x128xf32>
    %cst_5 = arith.constant 0.000000e+00 : f32
    %12 = vector.broadcast %cst_5 : f32 to vector<128x128xf32>
    %13 = arith.maximumf %11, %12 : vector<128x128xf32>
    %14 = tpu.iota {dimensions = array<i32: 0>} : vector<128x128xi32>
    %c0_6 = arith.constant 0 : index
    %c0_7 = arith.constant 0 : index
    %15 = vector.load %arg7[%c0_6, %c0_7] : memref<1x128xi32, #tpu.memory_space<vmem>>, vector<1x128xi32>
    %16 = vector.broadcast %15 : vector<1x128xi32> to vector<128x128xi32>
    %17 = arith.cmpi eq, %16, %14 : vector<128x128xi32>
    %c0_8 = arith.constant 0 : index
    %c0_9 = arith.constant 0 : index
    %18 = vector.load %arg6[%c0_8, %c0_9] : memref<1x128xf32, #tpu.memory_space<vmem>>, vector<1x128xf32>
    %cst_10 = arith.constant 0.000000e+00 : f32
    %19 = vector.shape_cast %18 : vector<1x128xf32> to vector<1x128xf32>
    %20 = vector.broadcast %19 : vector<1x128xf32> to vector<128x128xf32>
    %21 = vector.broadcast %cst_10 : f32 to vector<128x128xf32>
    %22 = arith.select %17, %20, %21 : vector<128x128xi1>, vector<128x128xf32>
    %c0_11 = arith.constant 0 : index
    %c0_12 = arith.constant 0 : index
    %23 = vector.load %arg9[%c0_11, %c0_12] : memref<128x128xf32, #tpu.memory_space<vmem>>, vector<128x128xf32>
    %cst_13 = arith.constant dense<0.000000e+00> : vector<128x128xf32>
    %24 = tpu.matmul %22, %13, %cst_13 {dimension_numbers = #tpu.dot_dimension_numbers<[1], [0], [0], [1], [0, 0, 1, 1], [], []>} : vector<128x128xf32>, vector<128x128xf32>, vector<128x128xf32> -> vector<128x128xf32>
    %25 = arith.addf %23, %24 : vector<128x128xf32>
    %c0_14 = arith.constant 0 : index
    %c0_15 = arith.constant 0 : index
    %26 = vector.load %arg9[%c0_14, %c0_15] : memref<128x128xf32, #tpu.memory_space<vmem>>, vector<128x128xf32>
    tpu.vector_store %arg9[%c0_14, %c0_15], %25 {strides = array<i32>} : memref<128x128xf32, #tpu.memory_space<vmem>>, vector<128x128xf32>,
    %c0_16 = arith.constant 0 : index
    %c0_17 = arith.constant 0 : index
    %27 = vector.load %arg9[%c0_16, %c0_17] : memref<128x128xf32, #tpu.memory_space<vmem>>, vector<128x128xf32>
    %c0_18 = arith.constant 0 : index
    %c0_19 = arith.constant 0 : index
    %28 = vector.load %arg8[%c0_18, %c0_19] : memref<128x128xf32, #tpu.memory_space<vmem>>, vector<128x128xf32>
    tpu.vector_store %arg8[%c0_18, %c0_19], %27 {strides = array<i32>} : memref<128x128xf32, #tpu.memory_space<vmem>>, vector<128x128xf32>,
    return
  }
  func.func @transform_0(%arg0: i32, %arg1: memref<6xi32, #tpu.memory_space<smem>>, %arg2: memref<6xi32, #tpu.memory_space<smem>>) -> (i32, i32) {
    %c0_i32 = arith.constant 0 : i32
    %c0_i32_0 = arith.constant 0 : i32
    return %arg0, %c0_i32 : i32, i32
  }
  func.func @transform_1(%arg0: i32, %arg1: memref<6xi32, #tpu.memory_space<smem>>, %arg2: memref<6xi32, #tpu.memory_space<smem>>) -> (i32, i32) {
    %c0_i32 = arith.constant 0 : i32
    %c0_i32_0 = arith.constant 0 : i32
    return %arg0, %c0_i32 : i32, i32
  }
  func.func @transform_2(%arg0: i32, %arg1: memref<6xi32, #tpu.memory_space<smem>>, %arg2: memref<6xi32, #tpu.memory_space<smem>>) -> (i32, i32) {
    %c0_i32 = arith.constant 0 : i32
    %c0_i32_0 = arith.constant 0 : i32
    %c0_i32_1 = arith.constant 0 : i32
    return %c0_i32, %c0_i32_0 : i32, i32
  }
  func.func @transform_3(%arg0: i32, %arg1: memref<6xi32, #tpu.memory_space<smem>>, %arg2: memref<6xi32, #tpu.memory_space<smem>>) -> (i32, i32) {
    %c0_i32 = arith.constant 0 : i32
    %c0_i32_0 = arith.constant 0 : i32
    return %c0_i32, %arg0 : i32, i32
  }
  func.func @transform_4(%arg0: i32, %arg1: memref<6xi32, #tpu.memory_space<smem>>, %arg2: memref<6xi32, #tpu.memory_space<smem>>) -> (i32, i32) {
    %c0_i32 = arith.constant 0 : i32
    %c0_i32_0 = arith.constant 0 : i32
    return %c0_i32, %arg0 : i32, i32
  }
  func.func @transform_5(%arg0: i32, %arg1: memref<6xi32, #tpu.memory_space<smem>>, %arg2: memref<6xi32, #tpu.memory_space<smem>>) -> (i32, i32) {
    %0 = arith.index_cast %arg0 : i32 to index
    %1 = memref.load %arg1[%0] : memref<6xi32, #tpu.memory_space<smem>>
    %c0_i32 = arith.constant 0 : i32
    %c0_i32_0 = arith.constant 0 : i32
    return %1, %c0_i32 : i32, i32
  }
}

module attributes {stable_mosaic.version = 11 : i64} {
  func.func @combine_stats_kernel(%arg0: i32, %arg1: memref<128x128xf32, #tpu.memory_space<vmem>>, %arg2: memref<128x128xbf16, #tpu.memory_space<vmem>>, %arg3: memref<1x128xf32, #tpu.memory_space<vmem>>, %arg4: memref<128x1xf32, #tpu.memory_space<vmem>>, %arg5: memref<128x128xbf16, #tpu.memory_space<vmem>>, %arg6: memref<1x1x128xf32, #tpu.memory_space<vmem>>, %arg7: memref<1x1x128xf32, #tpu.memory_space<vmem>>) attributes {dimension_semantics = [#tpu.dimension_semantics<parallel>], iteration_bounds = array<i64: 2>, scalar_prefetch = 0 : i64, scratch_operands = 0 : i64, tpu.core_type = #tpu.core_type<tc>, window_params = [{transform_indices = @transform_0, window_bounds = array<i64: 128, 128>}, {transform_indices = @transform_1, window_bounds = array<i64: 128, 128>}, {pipeline_mode = #tpu.pipeline_mode<synchronous>, transform_indices = @transform_2, window_bounds = array<i64: 1, 128>}, {transform_indices = @transform_3, window_bounds = array<i64: 128, 1>}, {transform_indices = @transform_4, window_bounds = array<i64: 128, 128>}, {transform_indices = @transform_5, window_bounds = array<i64: 1, 1, 128>}, {transform_indices = @transform_6, window_bounds = array<i64: 1, 1, 128>}]} {
    %c0 = arith.constant 0 : index
    %c0_0 = arith.constant 0 : index
    %0 = vector.load %arg1[%c0, %c0_0] : memref<128x128xf32, #tpu.memory_space<vmem>>, vector<128x128xf32>
    %c0_1 = arith.constant 0 : index
    %c0_2 = arith.constant 0 : index
    %1 = vector.load %arg2[%c0_1, %c0_2] : memref<128x128xbf16, #tpu.memory_space<vmem>>, vector<128x128xbf16>
    %2 = arith.extf %1 : vector<128x128xbf16> to vector<128x128xf32>
    %c0_3 = arith.constant 0 : index
    %c0_4 = arith.constant 0 : index
    %3 = vector.load %arg3[%c0_3, %c0_4] : memref<1x128xf32, #tpu.memory_space<vmem>>, vector<1x128xf32>
    %4 = vector.broadcast %3 : vector<1x128xf32> to vector<128x128xf32>
    %5 = arith.addf %2, %4 : vector<128x128xf32>
    %cst = arith.constant 0.000000e+00 : f32
    %6 = vector.broadcast %cst : f32 to vector<128x128xf32>
    %7 = arith.maximumf %5, %6 : vector<128x128xf32>
    %c0_5 = arith.constant 0 : index
    %c0_6 = arith.constant 0 : index
    %8 = vector.load %arg4[%c0_5, %c0_6] : memref<128x1xf32, #tpu.memory_space<vmem>>, vector<128x1xf32>
    %9 = vector.broadcast %8 : vector<128x1xf32> to vector<128x128xf32>
    %10 = arith.mulf %7, %9 : vector<128x128xf32>
    %11 = arith.addf %0, %10 : vector<128x128xf32>
    %12 = arith.truncf %11 : vector<128x128xf32> to vector<128x128xbf16>
    %c0_7 = arith.constant 0 : index
    %c0_8 = arith.constant 0 : index
    %13 = vector.load %arg5[%c0_7, %c0_8] : memref<128x128xbf16, #tpu.memory_space<vmem>>, vector<128x128xbf16>
    tpu.vector_store %arg5[%c0_7, %c0_8], %12 {strides = array<i32>} : memref<128x128xbf16, #tpu.memory_space<vmem>>, vector<128x128xbf16>,
    %c128_i32 = arith.constant 128 : i32
    %14 = arith.muli %arg0, %c128_i32 : i32
    %15 = tpu.iota {dimensions = array<i32: 0>} : vector<128x1xi32>
    %16 = vector.broadcast %14 : i32 to vector<128x1xi32>
    %17 = arith.addi %16, %15 : vector<128x1xi32>
    %c256_i32 = arith.constant 256 : i32
    %18 = vector.broadcast %c256_i32 : i32 to vector<128x1xi32>
    %19 = arith.cmpi slt, %17, %18 : vector<128x1xi32>
    %cst_9 = arith.constant 0.000000e+00 : f32
    %20 = vector.shape_cast %19 : vector<128x1xi1> to vector<128x1xi1>
    %21 = vector.broadcast %20 : vector<128x1xi1> to vector<128x128xi1>
    %22 = vector.broadcast %cst_9 : f32 to vector<128x128xf32>
    %23 = arith.select %21, %11, %22 : vector<128x128xi1>, vector<128x128xf32>
    %cst_10 = arith.constant dense<0.000000e+00> : vector<128xf32>
    %24 = vector.multi_reduction <add>, %23, %cst_10 [0] : vector<128x128xf32> to vector<128xf32>
    %25 = vector.shape_cast %24 : vector<128xf32> to vector<1x128xf32>
    %26 = vector.shape_cast %25 : vector<1x128xf32> to vector<1x1x128xf32>
    %c0_11 = arith.constant 0 : index
    %c0_12 = arith.constant 0 : index
    %c0_13 = arith.constant 0 : index
    %27 = vector.load %arg6[%c0_11, %c0_12, %c0_13] : memref<1x1x128xf32, #tpu.memory_space<vmem>>, vector<1x1x128xf32>
    tpu.vector_store %arg6[%c0_11, %c0_12, %c0_13], %26 {strides = array<i32>} : memref<1x1x128xf32, #tpu.memory_space<vmem>>, vector<1x1x128xf32>,
    %28 = arith.mulf %23, %23 : vector<128x128xf32>
    %cst_14 = arith.constant dense<0.000000e+00> : vector<128xf32>
    %29 = vector.multi_reduction <add>, %28, %cst_14 [0] : vector<128x128xf32> to vector<128xf32>
    %30 = vector.shape_cast %29 : vector<128xf32> to vector<1x128xf32>
    %31 = vector.shape_cast %30 : vector<1x128xf32> to vector<1x1x128xf32>
    %c0_15 = arith.constant 0 : index
    %c0_16 = arith.constant 0 : index
    %c0_17 = arith.constant 0 : index
    %32 = vector.load %arg7[%c0_15, %c0_16, %c0_17] : memref<1x1x128xf32, #tpu.memory_space<vmem>>, vector<1x1x128xf32>
    tpu.vector_store %arg7[%c0_15, %c0_16, %c0_17], %31 {strides = array<i32>} : memref<1x1x128xf32, #tpu.memory_space<vmem>>, vector<1x1x128xf32>,
    return
  }
  func.func @transform_0(%arg0: i32) -> (i32, i32) {
    %c0_i32 = arith.constant 0 : i32
    %c0_i32_0 = arith.constant 0 : i32
    return %arg0, %c0_i32 : i32, i32
  }
  func.func @transform_1(%arg0: i32) -> (i32, i32) {
    %c0_i32 = arith.constant 0 : i32
    %c0_i32_0 = arith.constant 0 : i32
    return %arg0, %c0_i32 : i32, i32
  }
  func.func @transform_2(%arg0: i32) -> (i32, i32) {
    %c0_i32 = arith.constant 0 : i32
    %c0_i32_0 = arith.constant 0 : i32
    %c0_i32_1 = arith.constant 0 : i32
    return %c0_i32, %c0_i32_0 : i32, i32
  }
  func.func @transform_3(%arg0: i32) -> (i32, i32) {
    %c0_i32 = arith.constant 0 : i32
    %c0_i32_0 = arith.constant 0 : i32
    return %arg0, %c0_i32 : i32, i32
  }
  func.func @transform_4(%arg0: i32) -> (i32, i32) {
    %c0_i32 = arith.constant 0 : i32
    %c0_i32_0 = arith.constant 0 : i32
    return %arg0, %c0_i32 : i32, i32
  }
  func.func @transform_5(%arg0: i32) -> (i32, i32, i32) {
    %c0_i32 = arith.constant 0 : i32
    %c0_i32_0 = arith.constant 0 : i32
    %c0_i32_1 = arith.constant 0 : i32
    return %arg0, %c0_i32, %c0_i32_0 : i32, i32, i32
  }
  func.func @transform_6(%arg0: i32) -> (i32, i32, i32) {
    %c0_i32 = arith.constant 0 : i32
    %c0_i32_0 = arith.constant 0 : i32
    %c0_i32_1 = arith.constant 0 : i32
    return %arg0, %c0_i32, %c0_i32_0 : i32, i32, i32
  }
}

module attributes {stable_mosaic.version = 11 : i64} {
  func.func @bn_apply_kernel(%arg0: i32, %arg1: memref<128x128xbf16, #tpu.memory_space<vmem>>, %arg2: memref<1x128xf32, #tpu.memory_space<vmem>>, %arg3: memref<1x128xf32, #tpu.memory_space<vmem>>, %arg4: memref<128x128xf32, #tpu.memory_space<vmem>>, %arg5: memref<128x128xbf16, #tpu.memory_space<vmem>>, %arg6: memref<128x128xf32, #tpu.memory_space<vmem>>) attributes {dimension_semantics = [#tpu.dimension_semantics<parallel>], iteration_bounds = array<i64: 2>, scalar_prefetch = 0 : i64, scratch_operands = 0 : i64, tpu.core_type = #tpu.core_type<tc>, window_params = [{transform_indices = @transform_0, window_bounds = array<i64: 128, 128>}, {pipeline_mode = #tpu.pipeline_mode<synchronous>, transform_indices = @transform_1, window_bounds = array<i64: 1, 128>}, {pipeline_mode = #tpu.pipeline_mode<synchronous>, transform_indices = @transform_2, window_bounds = array<i64: 1, 128>}, {transform_indices = @transform_3, window_bounds = array<i64: 128, 128>}, {transform_indices = @transform_4, window_bounds = array<i64: 128, 128>}, {transform_indices = @transform_5, window_bounds = array<i64: 128, 128>}]} {
    %c0 = arith.constant 0 : index
    %c0_0 = arith.constant 0 : index
    %0 = vector.load %arg1[%c0, %c0_0] : memref<128x128xbf16, #tpu.memory_space<vmem>>, vector<128x128xbf16>
    %1 = arith.extf %0 : vector<128x128xbf16> to vector<128x128xf32>
    %c0_1 = arith.constant 0 : index
    %c0_2 = arith.constant 0 : index
    %2 = vector.load %arg2[%c0_1, %c0_2] : memref<1x128xf32, #tpu.memory_space<vmem>>, vector<1x128xf32>
    %3 = vector.broadcast %2 : vector<1x128xf32> to vector<128x128xf32>
    %4 = arith.mulf %1, %3 : vector<128x128xf32>
    %c0_3 = arith.constant 0 : index
    %c0_4 = arith.constant 0 : index
    %5 = vector.load %arg3[%c0_3, %c0_4] : memref<1x128xf32, #tpu.memory_space<vmem>>, vector<1x128xf32>
    %6 = vector.broadcast %5 : vector<1x128xf32> to vector<128x128xf32>
    %7 = arith.addf %4, %6 : vector<128x128xf32>
    %cst = arith.constant 0.000000e+00 : f32
    %8 = vector.broadcast %cst : f32 to vector<128x128xf32>
    %9 = arith.maximumf %7, %8 : vector<128x128xf32>
    %10 = arith.truncf %9 : vector<128x128xf32> to vector<128x128xbf16>
    %c0_5 = arith.constant 0 : index
    %c0_6 = arith.constant 0 : index
    %11 = vector.load %arg5[%c0_5, %c0_6] : memref<128x128xbf16, #tpu.memory_space<vmem>>, vector<128x128xbf16>
    tpu.vector_store %arg5[%c0_5, %c0_6], %10 {strides = array<i32>} : memref<128x128xbf16, #tpu.memory_space<vmem>>, vector<128x128xbf16>,
    %c0_7 = arith.constant 0 : index
    %c0_8 = arith.constant 0 : index
    %12 = vector.load %arg4[%c0_7, %c0_8] : memref<128x128xf32, #tpu.memory_space<vmem>>, vector<128x128xf32>
    %13 = arith.addf %12, %9 : vector<128x128xf32>
    %c0_9 = arith.constant 0 : index
    %c0_10 = arith.constant 0 : index
    %14 = vector.load %arg6[%c0_9, %c0_10] : memref<128x128xf32, #tpu.memory_space<vmem>>, vector<128x128xf32>
    tpu.vector_store %arg6[%c0_9, %c0_10], %13 {strides = array<i32>} : memref<128x128xf32, #tpu.memory_space<vmem>>, vector<128x128xf32>,
    return
  }
  func.func @transform_0(%arg0: i32) -> (i32, i32) {
    %c0_i32 = arith.constant 0 : i32
    %c0_i32_0 = arith.constant 0 : i32
    return %arg0, %c0_i32 : i32, i32
  }
  func.func @transform_1(%arg0: i32) -> (i32, i32) {
    %c0_i32 = arith.constant 0 : i32
    %c0_i32_0 = arith.constant 0 : i32
    %c0_i32_1 = arith.constant 0 : i32
    return %c0_i32, %c0_i32_0 : i32, i32
  }
  func.func @transform_2(%arg0: i32) -> (i32, i32) {
    %c0_i32 = arith.constant 0 : i32
    %c0_i32_0 = arith.constant 0 : i32
    %c0_i32_1 = arith.constant 0 : i32
    return %c0_i32, %c0_i32_0 : i32, i32
  }
  func.func @transform_3(%arg0: i32) -> (i32, i32) {
    %c0_i32 = arith.constant 0 : i32
    %c0_i32_0 = arith.constant 0 : i32
    return %arg0, %c0_i32 : i32, i32
  }
  func.func @transform_4(%arg0: i32) -> (i32, i32) {
    %c0_i32 = arith.constant 0 : i32
    %c0_i32_0 = arith.constant 0 : i32
    return %arg0, %c0_i32 : i32, i32
  }
  func.func @transform_5(%arg0: i32) -> (i32, i32) {
    %c0_i32 = arith.constant 0 : i32
    %c0_i32_0 = arith.constant 0 : i32
    return %arg0, %c0_i32 : i32, i32
  }
}

module attributes {stable_mosaic.version = 11 : i64} {
  func.func @bn_apply_kernel(%arg0: i32, %arg1: memref<128x128xbf16, #tpu.memory_space<vmem>>, %arg2: memref<1x128xf32, #tpu.memory_space<vmem>>, %arg3: memref<1x128xf32, #tpu.memory_space<vmem>>, %arg4: memref<128x128xf32, #tpu.memory_space<vmem>>, %arg5: memref<128x128xbf16, #tpu.memory_space<vmem>>, %arg6: memref<128x128xf32, #tpu.memory_space<vmem>>) attributes {dimension_semantics = [#tpu.dimension_semantics<parallel>], iteration_bounds = array<i64: 2>, scalar_prefetch = 0 : i64, scratch_operands = 0 : i64, tpu.core_type = #tpu.core_type<tc>, window_params = [{transform_indices = @transform_0, window_bounds = array<i64: 128, 128>}, {pipeline_mode = #tpu.pipeline_mode<synchronous>, transform_indices = @transform_1, window_bounds = array<i64: 1, 128>}, {pipeline_mode = #tpu.pipeline_mode<synchronous>, transform_indices = @transform_2, window_bounds = array<i64: 1, 128>}, {transform_indices = @transform_3, window_bounds = array<i64: 128, 128>}, {transform_indices = @transform_4, window_bounds = array<i64: 128, 128>}, {transform_indices = @transform_5, window_bounds = array<i64: 128, 128>}]} {
    %c0 = arith.constant 0 : index
    %c0_0 = arith.constant 0 : index
    %0 = vector.load %arg1[%c0, %c0_0] : memref<128x128xbf16, #tpu.memory_space<vmem>>, vector<128x128xbf16>
    %1 = arith.extf %0 : vector<128x128xbf16> to vector<128x128xf32>
    %c0_1 = arith.constant 0 : index
    %c0_2 = arith.constant 0 : index
    %2 = vector.load %arg2[%c0_1, %c0_2] : memref<1x128xf32, #tpu.memory_space<vmem>>, vector<1x128xf32>
    %3 = vector.broadcast %2 : vector<1x128xf32> to vector<128x128xf32>
    %4 = arith.mulf %1, %3 : vector<128x128xf32>
    %c0_3 = arith.constant 0 : index
    %c0_4 = arith.constant 0 : index
    %5 = vector.load %arg3[%c0_3, %c0_4] : memref<1x128xf32, #tpu.memory_space<vmem>>, vector<1x128xf32>
    %6 = vector.broadcast %5 : vector<1x128xf32> to vector<128x128xf32>
    %7 = arith.addf %4, %6 : vector<128x128xf32>
    %8 = arith.truncf %7 : vector<128x128xf32> to vector<128x128xbf16>
    %c0_5 = arith.constant 0 : index
    %c0_6 = arith.constant 0 : index
    %9 = vector.load %arg5[%c0_5, %c0_6] : memref<128x128xbf16, #tpu.memory_space<vmem>>, vector<128x128xbf16>
    tpu.vector_store %arg5[%c0_5, %c0_6], %8 {strides = array<i32>} : memref<128x128xbf16, #tpu.memory_space<vmem>>, vector<128x128xbf16>,
    %c0_7 = arith.constant 0 : index
    %c0_8 = arith.constant 0 : index
    %10 = vector.load %arg4[%c0_7, %c0_8] : memref<128x128xf32, #tpu.memory_space<vmem>>, vector<128x128xf32>
    %11 = arith.addf %10, %7 : vector<128x128xf32>
    %c0_9 = arith.constant 0 : index
    %c0_10 = arith.constant 0 : index
    %12 = vector.load %arg6[%c0_9, %c0_10] : memref<128x128xf32, #tpu.memory_space<vmem>>, vector<128x128xf32>
    tpu.vector_store %arg6[%c0_9, %c0_10], %11 {strides = array<i32>} : memref<128x128xf32, #tpu.memory_space<vmem>>, vector<128x128xf32>,
    return
  }
  func.func @transform_0(%arg0: i32) -> (i32, i32) {
    %c0_i32 = arith.constant 0 : i32
    %c0_i32_0 = arith.constant 0 : i32
    return %arg0, %c0_i32 : i32, i32
  }
  func.func @transform_1(%arg0: i32) -> (i32, i32) {
    %c0_i32 = arith.constant 0 : i32
    %c0_i32_0 = arith.constant 0 : i32
    %c0_i32_1 = arith.constant 0 : i32
    return %c0_i32, %c0_i32_0 : i32, i32
  }
  func.func @transform_2(%arg0: i32) -> (i32, i32) {
    %c0_i32 = arith.constant 0 : i32
    %c0_i32_0 = arith.constant 0 : i32
    %c0_i32_1 = arith.constant 0 : i32
    return %c0_i32, %c0_i32_0 : i32, i32
  }
  func.func @transform_3(%arg0: i32) -> (i32, i32) {
    %c0_i32 = arith.constant 0 : i32
    %c0_i32_0 = arith.constant 0 : i32
    return %arg0, %c0_i32 : i32, i32
  }
  func.func @transform_4(%arg0: i32) -> (i32, i32) {
    %c0_i32 = arith.constant 0 : i32
    %c0_i32_0 = arith.constant 0 : i32
    return %arg0, %c0_i32 : i32, i32
  }
  func.func @transform_5(%arg0: i32) -> (i32, i32) {
    %c0_i32 = arith.constant 0 : i32
    %c0_i32_0 = arith.constant 0 : i32
    return %arg0, %c0_i32 : i32, i32
  }
}

</mosaic_0001>

<bundles_post_ra>
// kernel: custom-call
= control target key start
LH: loop header
LB: loop body
LE: loop exit
PB: predicated region body
PF: predicated region fallthrough
CT: control target
= control target key end

     0   :  { %s6_s0 = inlined_call_operand.vmem [shape: u32[6], index: 0, kind: output, shape index: {}]  }

// kernel: gnn_node_forward.8
= control target key start
LH: loop header
LB: loop body
LE: loop exit
PB: predicated region body
PF: predicated region fallthrough
CT: control target
= control target key end

     0   :  { %s766_s12 = smov 0   ;;  %s837_s0 = inlined_call_operand.vmem [shape: bf16[256,128], index: 0, kind: input, shape index: {}]   ;;  %s838_s1 = inlined_call_operand.vmem [shape: bf16[128,128], index: 1, kind: input, shape index: {}]   ;;  %s839_s2 = inlined_call_operand.vmem [shape: f32[1,128], index: 2, kind: input, shape index: {}]   ;;  %s840_s3 = inlined_call_operand.vmem [shape: bf16[256,128], index: 3, kind: output, shape index: {}]  }
   0x1 LB: > { %s543_s13 = sadd.s32 4294967295, %s744_s12   ;;  %p547_p0 = scmp.ge.s32.totalorder %s744_s12, 1  ;;  %s744_s12 = sphi %s766_s12, %s13_s12  }
   0x2   : > { %p138_p1 = scmp.lt.s32.totalorder %s744_s12, 3 }
   0x4   : > { %p139_p2 = pnand %p547_p0, %p138_p1 }
   0x5   : > { %v722_v0 = vld [vmem:[%s838_s1] sm:$0xff] (!%p139_p2)   ;;  %s548_s16 = sshll.u32 (!%p139_p2), %s543_s13, 4  ;;  %v723_v1 = vld [vmem:[%s838_s1 + $0x8] sm:$0xff] (!%p139_p2)   ;;  %v724_v2 = vld [vmem:[%s838_s1 + $0x10] sm:$0xff] (!%p139_p2)  }
   0x6   : > { %142 = sbr.rel (%p139_p2) target bundleno = 266 (0x10a), region = 32  ;;  %p163_p3 = scmp.lt.s32.totalorder (!%p139_p2), %s548_s16, 31  ;;  %666 = vmatprep.subr.bf16.mxu0 (!%p139_p2), %v722_v0  ;;  %698 = vmatprep.subr.bf16.mxu1 (!%p139_p2), %v722_v0  ;;  %v725_v3 = vld [vmem:[%s838_s1 + $0x18] sm:$0xff] (!%p139_p2)   ;;  %v726_v6 = vld [vmem:[%s838_s1 + $0x20] sm:$0xff] (!%p139_p2)   ;;  %v727_v7 = vld [vmem:[%s838_s1 + $0x28] sm:$0xff] (!%p139_p2)  }
   0x7   : > { %667 = vmatpush3.bf16.msra.mxu0 (!%p139_p2), %v722_v0  ;;  %706 = vmatpush3.bf16.msra.mxu1 (!%p139_p2), %v722_v0  ;;  %v728_v8 = vld [vmem:[%s838_s1 + $0x30] sm:$0xff] (!%p139_p2)   ;;  %v729_v9 = vld [vmem:[%s838_s1 + $0x38] sm:$0xff] (!%p139_p2)   ;;  %v552_v17 = vld [vmem:[%s839_s2] ss:$0 sm:$0xff] (!%p139_p2) }
   0x8   : > { %668 = vmatprep.subr.bf16.mxu0 (!%p139_p2), %v723_v1  ;;  %699 = vmatprep.subr.bf16.mxu1 (!%p139_p2), %v723_v1 }
   0xb   : > { %669 = vmatpush3.bf16.msra.mxu0 (!%p139_p2), %v723_v1  ;;  %707 = vmatpush3.bf16.msra.mxu1 (!%p139_p2), %v723_v1 }
   0xc   : > { %670 = vmatprep.subr.bf16.mxu0 (!%p139_p2), %v724_v2  ;;  %700 = vmatprep.subr.bf16.mxu1 (!%p139_p2), %v724_v2 }
   0xd   : > { %s842_s16 = smov (!%p163_p3, %s548_s16), 31 }
   0xe   : > { %s549_s21 = sshll.u32 %s842_s16, 2 }
   0xf   : > { %s791_s24 = scalar_lea.vmem %s837_s0, %s549_s21  ;;  %671 = vmatpush3.bf16.msra.mxu0 %v724_v2  ;;  %708 = vmatpush3.bf16.msra.mxu1 %v724_v2  ;;  %s824_s13 = scalar_lea.vmem %s840_s3, %s549_s21 }
  0x10   : > { %v730_v4 = vld [vmem:[%s791_s24] sm:$0xff]   ;;  %672 = vmatprep.subr.bf16.mxu0 %v725_v3  ;;  %701 = vmatprep.subr.bf16.mxu1 %v725_v3  ;;  %v732_v10 = vld [vmem:[%s791_s24 + $0x8] sm:$0xff]   ;;  %v734_v12 = vld [vmem:[%s791_s24 + $0x10] sm:$0xff]  }
  0x11   : > { %v731_v5 = vld [vmem:[%s791_s24 + $0x20] sm:$0xff]   ;;  %682 = vmatprep.mubr.bf16.mxu0 %v730_v4  ;;  %v733_v11 = vld [vmem:[%s791_s24 + $0x28] sm:$0xff]   ;;  %v735_v13 = vld [vmem:[%s791_s24 + $0x30] sm:$0xff]  }
  0x12   : > { %690 = vmatprep.mubr.bf16.mxu1 %v731_v5  ;;  %v736_v14 = vld [vmem:[%s791_s24 + $0x18] sm:$0xff]  }
  0x13   : > { %673 = vmatpush3.bf16.msra.mxu0 %v725_v3  ;;  %709 = vmatpush3.bf16.msra.mxu1 %v725_v3  ;;  %v737_v15 = vld [vmem:[%s791_s24 + $0x38] sm:$0xff]  }
  0x14   : > { %674 = vmatprep.subr.bf16.mxu0 %v726_v6  ;;  %702 = vmatprep.subr.bf16.mxu1 %v726_v6 }
  0x17   : > { %675 = vmatpush3.bf16.msra.mxu0 %v726_v6  ;;  %710 = vmatpush3.bf16.msra.mxu1 %v726_v6 }
  0x18   : > { %676 = vmatprep.subr.bf16.mxu0 %v727_v7  ;;  %703 = vmatprep.subr.bf16.mxu1 %v727_v7 }
  0x1b   : > { %677 = vmatpush3.bf16.msra.mxu0 %v727_v7  ;;  %711 = vmatpush3.bf16.msra.mxu1 %v727_v7 }
  0x1c   : > { %678 = vmatprep.subr.bf16.mxu0 %v728_v8  ;;  %704 = vmatprep.subr.bf16.mxu1 %v728_v8 }
  0x1f   : > { %679 = vmatpush3.bf16.msra.mxu0 %v728_v8  ;;  %712 = vmatpush3.bf16.msra.mxu1 %v728_v8 }
  0x20   : > { %680 = vmatprep.subr.bf16.mxu0 %v729_v9  ;;  %705 = vmatprep.subr.bf16.mxu1 %v729_v9 }
  0x23   : > { %681 = vmatpush3.bf16.msra.mxu0 %v729_v9  ;;  %713 = vmatpush3.bf16.msra.mxu1 %v729_v9 }
  0x26   : > { %683 = vmatmul.mubr.bf16.vlgmr.msra.gmra.mrb[0].mxu0 %v732_v10  ;;  %691 = vmatmul.mubr.bf16.vlgmr.msra.gmra.mrb[0].mxu1 %v733_v11 }
  0x27   : > { %686 = vmatprep.mubr.bf16.mxu0 %v734_v12  ;;  %694 = vmatprep.mubr.bf16.mxu1 %v735_v13 }
  0x2e   : > { %687 = vmatmul.mubr.bf16.gmra.mrb[4].mxu0 %v736_v14  ;;  %695 = vmatmul.mubr.bf16.gmra.mrb[4].mxu1 %v737_v15 }
  0xf9   : > { %v684_v16 = vpop.f32.mrb[0].mxu0  ;;  %v692_v18 = vpop.f32.mrb[0].mxu1 }
  0xfa   : > { %v344_v19 = vpop.f32.mrb[1].mxu0  ;;  %v376_v20 = vpop.f32.mrb[1].mxu1  ;;  %v353_v23 = vadd.f32 %v684_v16, %v552_v17  ;;  %v385_v24 = vadd.f32 %v692_v18, %v552_v17 }
  0xfb   : > { %v685_v21 = vpop.f32.mrb[2].mxu0  ;;  %v693_v22 = vpop.f32.mrb[2].mxu1  ;;  %v345_v29 = vadd.f32 %v552_v17, %v344_v19  ;;  %v377_v30 = vadd.f32 %v552_v17, %v376_v20 }
  0xfc   : > { %v356_v25 = vadd.f32 %v685_v21, %v552_v17  ;;  %v388_v26 = vadd.f32 %v693_v22, %v552_v17  ;;  %v347_v27 = vpop.f32.mrb[3].mxu0  ;;  %v379_v28 = vpop.f32.mrb[3].mxu1 }
  0xfd   : > { %v348_v31 = vadd.f32 %v552_v17, %v347_v27  ;;  %v380_v32 = vadd.f32 %v552_v17, %v379_v28 }
  0xfe   : > { %v611_v33 = vpack.c.bf16 %v356_v25, %v353_v23  ;;  %v631_v34 = vpack.c.bf16 %v388_v26, %v385_v24 }
  0xff   : > { %v606_v35 = vpack.c.bf16 %v348_v31, %v345_v29  ;;  %v626_v36 = vpack.c.bf16 %v380_v32, %v377_v30 }
 0x100   : > { %643 = vst [vmem:[%s824_s13 + $0x8] sm:$0xff] %v611_v33   ;;  %647 = vst [vmem:[%s824_s13 + $0x28] sm:$0xff] %v631_v34  }
 0x101   : > { %607 = vst [vmem:[%s824_s13] sm:$0xff] %v606_v35   ;;  %646 = vst [vmem:[%s824_s13 + $0x20] sm:$0xff] %v626_v36   ;;  %v688_v37 = vpop.f32.mrb[4].mxu0  ;;  %v696_v38 = vpop.f32.mrb[4].mxu1 }
 0x102   : > { %v360_v39 = vpop.f32.mrb[5].mxu0  ;;  %v392_v40 = vpop.f32.mrb[5].mxu1  ;;  %v369_v43 = vadd.f32 %v688_v37, %v552_v17  ;;  %v401_v44 = vadd.f32 %v696_v38, %v552_v17 }
 0x103   : > { %v689_v41 = vpop.f32.mrb[6].mxu0  ;;  %v697_v42 = vpop.f32.mrb[6].mxu1  ;;  %v361_v49 = vadd.f32 %v552_v17, %v360_v39  ;;  %v393_v50 = vadd.f32 %v552_v17, %v392_v40 }
 0x104   : > { %v372_v45 = vadd.f32 %v689_v41, %v552_v17  ;;  %v404_v46 = vadd.f32 %v697_v42, %v552_v17  ;;  %v363_v47 = vpop.f32.mrb[7].mxu0  ;;  %v395_v48 = vpop.f32.mrb[7].mxu1 }
 0x105   : > { %v364_v51 = vadd.f32 %v552_v17, %v363_v47  ;;  %v396_v52 = vadd.f32 %v552_v17, %v395_v48 }
 0x106   : > { %v621_v53 = vpack.c.bf16 %v372_v45, %v369_v43  ;;  %v641_v54 = vpack.c.bf16 %v404_v46, %v401_v44 }
 0x107   : > { %v616_v55 = vpack.c.bf16 %v364_v51, %v361_v49  ;;  %v636_v56 = vpack.c.bf16 %v396_v52, %v393_v50 }
 0x108   : > { %645 = vst [vmem:[%s824_s13 + $0x18] sm:$0xff] %v621_v53   ;;  %649 = vst [vmem:[%s824_s13 + $0x38] sm:$0xff] %v641_v54  }
 0x109   : > { %644 = vst [vmem:[%s824_s13 + $0x10] sm:$0xff] %v616_v55   ;;  %648 = vst [vmem:[%s824_s13 + $0x30] sm:$0xff] %v636_v56  }
 0x10a PF: > { %s13_s12 = sadd.s32 1, %s744_s12  }
 0x10b   : > { %p10_p4 = scmp.ge.s32.totalorder %s13_s12, 4  }
 0x10d   :  { %12 = sbr.rel (!%p10_p4) target bundleno = 1 (0x1), region = 62 }

// kernel: mul.12
= control target key start
LH: loop header
LB: loop body
LE: loop exit
PB: predicated region body
PF: predicated region fallthrough
CT: control target
= control target key end

     0   :  { %s34_s0 = inlined_call_operand.vmem [shape: f32[512], index: 0, kind: input, shape index: {}]   ;;  %s35_s1 = inlined_call_operand.vmem [shape: f32[512], index: 1, kind: input, shape index: {}]   ;;  %s36_s2 = inlined_call_operand.vmem [shape: f32[512], index: 2, kind: output, shape index: {}]  }
   0x1   :  { %v3_v0 = vld [vmem:[%s34_s0] sm:$0xf] }
   0x2   :  { %v4_v1 = vld [vmem:[%s35_s1] sm:$0xf] }
   0x3   :  { %v7_v2 = vmul.f32 %v4_v1, %v3_v0 }
   0x5   :  { %9 = vst [vmem:[%s36_s2] sm:$0xf] %v7_v2 }

// kernel: gnn_node_forward.10
= control target key start
LH: loop header
LB: loop body
LE: loop exit
PB: predicated region body
PF: predicated region fallthrough
CT: control target
= control target key end

     0   :  { %s1090_s21 = smov 0   ;;  %s1366_s0 = inlined_call_operand.vmem [shape: f32[256,128], index: 0, kind: input, shape index: {}]   ;;  %s1367_s1 = inlined_call_operand.vmem [shape: bf16[256,128], index: 1, kind: input, shape index: {}]   ;;  %s1368_s2 = inlined_call_operand.vmem [shape: f32[1,128], index: 2, kind: input, shape index: {}]   ;;  %s1369_s3 = inlined_call_operand.vmem [shape: f32[256,1], index: 3, kind: input, shape index: {}]   ;;  %s1370_s4 = inlined_call_operand.vmem [shape: bf16[256,128], index: 4, kind: output, shape index: {0}]   ;;  %s1371_s5 = inlined_call_operand.vmem [shape: f32[2,1,128], index: 5, kind: output, shape index: {1}]   ;;  %s1372_s6 = inlined_call_operand.vmem [shape: f32[2,1,128], index: 6, kind: output, shape index: {2}]  }
   0x1 LB: > { %s1096_s22 = sadd.s32 4294967295, %s1052_s21   ;;  %p904_p0 = scmp.ge.s32.totalorder %s1052_s21, 1  ;;  %s1052_s21 = sphi %s1090_s21, %s17_s21  }
   0x2   : > { %p240_p1 = scmp.lt.s32.totalorder %s1052_s21, 3 }
   0x4   : > { %p241_p2 = pnand %p904_p0, %p240_p1 }
   0x5   : > { %s905_s23 = sshll.u32 (!%p241_p2), %s1096_s22, 4  ;;  %v1054_v0 = vmov (!%p241_p2), 0   ;;  %v612_v17 = vlaneseq (!%p241_p2)  ;;  %s930_s8 = sshll.u32 (!%p241_p2), %s1096_s22, 7  ;;  %v1129_v28 = vld [vmem:[%s1368_s2] ss:$0 sm:$0xff] (!%p241_p2) }
   0x6   : > { %244 = sbr.rel (%p241_p2) target bundleno = 199 (0xc7), region = 36  ;;  %1045 = vset.pattern.permute.xlu1 (!%p241_p2), %v1054_v0  ;;  %1044 = vset.pattern.permute.xlu0 (!%p241_p2), %v1054_v0  ;;  %p287_p3 = scmp.lt.s32.totalorder (!%p241_p2), %s905_s23, 31  ;;  %v1123_v24 = vstv (!%p241_p2), %s930_s8 }
   0x7   : > { %v1121_v22 = vshrl.u32 (!%p241_p2), %v612_v17, 7  ;;  %p310_p4 = scmp.lt.s32.totalorder (!%p241_p2), %s1096_s22, 1 }
   0x9   : > { %v615_v29 = vadd.s32 (!%p241_p2), 16, %v1121_v22  ;;  %v614_v30 = vadd.s32 (!%p241_p2), 8, %v1121_v22  ;;  %v616_v32 = vadd.s32 (!%p241_p2), 24, %v1121_v22  ;;  %v1137_v35 = vadd.s32 (!%p241_p2), %v1123_v24, %v1121_v22 }
   0xa   : > { %v618_v41 = vadd.s32 (!%p241_p2), 40, %v1121_v22  ;;  %v617_v45 = vadd.s32 (!%p241_p2), 32, %v1121_v22  ;;  %v620_v58 = vadd.s32 (!%p241_p2), 56, %v1121_v22 }
   0xb   : > { %v1149_v42 = vadd.s32 (!%p241_p2), %v1123_v24, %v615_v29  ;;  %v1152_v43 = vadd.s32 (!%p241_p2), %v1123_v24, %v614_v30  ;;  %v1159_v46 = vadd.s32 (!%p241_p2), %v1123_v24, %v616_v32  ;;  %vm646_vm0 = vcmp.lt.s32.totalorder (!%p241_p2), %v1137_v35, 256 }
   0xc   : > { %v1179_v57 = vadd.s32 (!%p241_p2), %v1123_v24, %v618_v41  ;;  %v1187_v61 = vadd.s32 (!%p241_p2), %v1123_v24, %v617_v45 }
   0xd   : > { %s1374_s23 = smov (!%p287_p3, %s905_s23), 31  ;;  %vm648_vm1 = vcmp.lt.s32.totalorder %v1149_v42, 256  ;;  %vm647_vm2 = vcmp.lt.s32.totalorder %v1152_v43, 256  ;;  %vm649_vm3 = vcmp.lt.s32.totalorder %v1159_v46, 256  ;;  %s1376_s22 = smov (!%p310_p4, %s1096_s22), 1 }
   0xe   : > { %s906_s24 = sshll.u32 %s1374_s23, 3  ;;  %s908_s28 = sshll.u32 %s1374_s23, 2  ;;  %vm651_vm4 = vcmp.lt.s32.totalorder %v1179_v57, 256  ;;  %vm650_vm5 = vcmp.lt.s32.totalorder %v1187_v61, 256 }
   0xf   : > { %s302_s27 = scalar_lea.vmem %s1369_s3, %s906_s24  ;;  %s1115_s7 = scalar_lea.vmem %s1367_s1, %s908_s28 }
  0x10   : > { %v405_v1 = vld [vmem:[%s302_s27 + $0x10] sm:$0xff]  ;;  %v403_v2 = vld [vmem:[%s302_s27] sm:$0xff]  ;;  %v406_v3 = vld [vmem:[%s302_s27 + $0x18] sm:$0xff]  ;;  %s1175_s13 = scalar_lea.vmem %s1366_s0, %s906_s24  ;;  %s1258_s16 = scalar_lea.vmem %s1370_s4, %s908_s28 }
  0x11   : > { %431 = vperm.xlu1 %1045, %v405_v1   ;;  %421 = vperm.xlu0 %1044, %v403_v2   ;;  %v404_v4 = vld [vmem:[%s302_s27 + $0x8] sm:$0xff]  ;;  %v407_v6 = vld [vmem:[%s302_s27 + $0x20] sm:$0xff]  ;;  %v410_v7 = vld [vmem:[%s302_s27 + $0x38] sm:$0xff]  ;;  %v619_v2 = vadd.s32 48, %v1121_v22  ;;  %s312_s19 = scalar_lea.vmem %s1371_s5, %s1376_s22  ;;  %s315_s24 = scalar_lea.vmem %s1372_s6, %s1376_s22 }
  0x12   : > { %v408_v5 = vld [vmem:[%s302_s27 + $0x28] sm:$0xff]  ;;  %v409_v8 = vld [vmem:[%s302_s27 + $0x30] sm:$0xff]  ;;  %v411_v10 = vld [vmem:[%s302_s27 + $0x40] sm:$0xff] }
  0x13   : > { %v412_v9 = vld [vmem:[%s302_s27 + $0x48] sm:$0xff]  ;;  %v414_v11 = vld [vmem:[%s302_s27 + $0x58] sm:$0xff]  ;;  %v413_v12 = vld [vmem:[%s302_s27 + $0x50] sm:$0xff] }
  0x14   : > { %v416_v13 = vld [vmem:[%s302_s27 + $0x68] sm:$0xff]  ;;  %v415_v14 = vld [vmem:[%s302_s27 + $0x60] sm:$0xff]  ;;  %v418_v15 = vld [vmem:[%s302_s27 + $0x78] sm:$0xff] }
  0x15   : > { %436 = vperm.xlu1 %1045, %v406_v3   ;;  %426 = vperm.xlu0 %1044, %v404_v4   ;;  %v417_v16 = vld [vmem:[%s302_s27 + $0x70] sm:$0xff]  ;;  %v1021_v18 = vld [vmem:[%s1115_s7 + $0x8] sm:$0xff]   ;;  %v950_v19 = vld [vmem:[%s1115_s7] sm:$0xff]  }
  0x16   : > { %v1022_v20 = vld [vmem:[%s1115_s7 + $0x10] sm:$0xff]   ;;  %v955_v21 = vunpack.c.l.bf16 %v1021_v18  ;;  %v956_v23 = vunpack.c.h.bf16 %v1021_v18  ;;  %v951_v25 = vunpack.c.l.bf16 %v950_v19  ;;  %v952_v26 = vunpack.c.h.bf16 %v950_v19  ;;  %v1023_v27 = vld [vmem:[%s1115_s7 + $0x18] sm:$0xff]   ;;  %v1024_v38 = vld [vmem:[%s1115_s7 + $0x20] sm:$0xff]  }
  0x17   : > { %v960_v31 = vunpack.c.h.bf16 %v1022_v20  ;;  %v959_v33 = vunpack.c.l.bf16 %v1022_v20  ;;  %v964_v37 = vunpack.c.h.bf16 %v1023_v27  ;;  %v963_v48 = vunpack.c.l.bf16 %v1023_v27  ;;  %v1025_v50 = vld [vmem:[%s1115_s7 + $0x28] sm:$0xff]   ;;  %v1026_v59 = vld [vmem:[%s1115_s7 + $0x30] sm:$0xff]   ;;  %v319_v27 = vld [vmem:[%s1175_s13 + $0x18] sm:$0xff] }
  0x18   : > { %v373_v34 = vadd.f32 %v955_v21, %v1129_v28  ;;  %v1140_v36 = vadd.f32 %v956_v23, %v1129_v28  ;;  %v371_v39 = vadd.f32 %v951_v25, %v1129_v28  ;;  %v1145_v40 = vadd.f32 %v952_v26, %v1129_v28  ;;  %v317_v30 = vld [vmem:[%s1175_s13 + $0x8] sm:$0xff] }
  0x19   : > { %446 = vperm.xlu1 %1045, %v408_v5   ;;  %441 = vperm.xlu0 %1044, %v407_v6   ;;  %v1155_v44 = vadd.f32 %v960_v31, %v1129_v28  ;;  %v1162_v47 = vadd.f32 %v959_v33, %v1129_v28  ;;  %v968_v49 = vunpack.c.h.bf16 %v1024_v38  ;;  %v1168_v53 = vadd.f32 %v964_v37, %v1129_v28  ;;  %v318_v5 = vld [vmem:[%s1175_s13 + $0x10] sm:$0xff] }
  0x1a   : > { %v389_v51 = vmax.f32 %v373_v34, 0.0  ;;  %v390_v52 = vmax.f32 %v1140_v36, 0.0  ;;  %v967_v54 = vunpack.c.l.bf16 %v1024_v38  ;;  %v387_v55 = vmax.f32 %v371_v39, 0.0 }
  0x1b   : > { %v388_v56 = vmax.f32 %v1145_v40, 0.0  ;;  %v392_v60 = vmax.f32 %v1155_v44, 0.0  ;;  %v972_v62 = vunpack.c.h.bf16 %v1025_v50  ;;  %v971_v63 = vunpack.c.l.bf16 %v1025_v50  ;;  %v1237_v40 = vld [vmem:[%s1115_s7 + $0x38] sm:$0xff]  }
  0x1c   : > { %v391_v0 = vmax.f32 %v1162_v47, 0.0  ;;  %v1191_v1 = vadd.f32 %v963_v48, %v1129_v28  ;;  %v1195_v3 = vadd.f32 %v968_v49, %v1129_v28  ;;  %v624_v18 = vadd.s32 88, %v1121_v22 }
  0x1d   : > { %456 = vperm.xlu1 %1045, %v410_v7   ;;  %451 = vperm.xlu0 %1044, %v409_v8   ;;  %v316_v7 = vld [vmem:[%s1175_s13] sm:$0xff]  ;;  %v394_v8 = vmax.f32 %v1168_v53, 0.0  ;;  %v1210_v17 = vadd.f32 %v972_v62, %v1129_v28  ;;  %v1214_v19 = vadd.f32 %v971_v63, %v1129_v28  ;;  %v1217_v23 = vadd.s32 %v1123_v24, %v619_v2 }
  0x1e   : > { %v623_v25 = vadd.s32 80, %v1121_v22  ;;  %v393_v31 = vmax.f32 %v1191_v1, 0.0  ;;  %v396_v32 = vmax.f32 %v1195_v3, 0.0  ;;  %v1244_v48 = vadd.s32 %v1123_v24, %v624_v18 }
  0x1f   : > { %v398_v45 = vmax.f32 %v1210_v17, 0.0  ;;  %v397_v49 = vmax.f32 %v1214_v19, 0.0  ;;  %vm652_vm6 = vcmp.lt.s32.totalorder %v1217_v23, 256  ;;  %v980_v62 = vunpack.c.h.bf16 %v1237_v40 }
  0x20   : > { %vm657_vm10 = vcmp.lt.s32.totalorder %v1244_v48, 256 }
  0x21   : > { %466 = vperm.xlu1 %1045, %v412_v9   ;;  %461 = vperm.xlu0 %1044, %v411_v10   ;;  %v1202_v9 = vadd.f32 %v967_v54, %v1129_v28  ;;  %v976_v10 = vunpack.c.h.bf16 %v1026_v59  ;;  %v1251_v54 = vadd.s32 %v1123_v24, %v623_v25 }
  0x23   : > { %v1227_v33 = vadd.f32 %v976_v10, %v1129_v28  ;;  %v395_v39 = vmax.f32 %v1202_v9, 0.0  ;;  %vm656_vm11 = vcmp.lt.s32.totalorder %v1251_v54, 256 }
  0x25   : > { %476 = vperm.xlu1 %1045, %v414_v11   ;;  %471 = vperm.xlu0 %1044, %v413_v12   ;;  %v975_v11 = vunpack.c.l.bf16 %v1026_v59  ;;  %v400_v35 = vmax.f32 %v1227_v33, 0.0 }
  0x27   : > { %v1230_v34 = vadd.f32 %v975_v11, %v1129_v28 }
  0x29   : > { %486 = vperm.xlu1 %1045, %v416_v13   ;;  %481 = vperm.xlu0 %1044, %v415_v14   ;;  %v1205_v14 = vadd.s32 %v1123_v24, %v620_v58  ;;  %v626_v58 = vadd.s32 104, %v1121_v22  ;;  %v399_v59 = vmax.f32 %v1230_v34, 0.0 }
  0x2b   : > { %vm653_vm7 = vcmp.lt.s32.totalorder %v1205_v14, 256 }
  0x2d   : > { %496 = vperm.xlu1 %1045, %v418_v15   ;;  %491 = vperm.xlu0 %1044, %v417_v16   ;;  %v622_v15 = vadd.s32 72, %v1121_v22  ;;  %v621_v16 = vadd.s32 64, %v1121_v22 }
  0x2f   : > { %v1233_v38 = vadd.s32 %v1123_v24, %v622_v15  ;;  %v1240_v41 = vadd.s32 %v1123_v24, %v621_v16  ;;  %v979_v15 = vunpack.c.l.bf16 %v1237_v40 }
  0x31   : > { %vm654_vm8 = vcmp.lt.s32.totalorder %v1240_v41, 256  ;;  %vm655_vm9 = vcmp.lt.s32.totalorder %v1233_v38, 256 }
  0x90   : > { %v432_v4 = vpop.permute.xlu1 %431  ;;  %v422_v6 = vpop.permute.xlu0 %421 }
  0x91   : > { %v501_v12 = vmul.f32 %v432_v4, %v389_v51  ;;  %v499_v13 = vmul.f32 %v422_v6, %v387_v55 }
  0x93   : > { %v517_v20 = vadd.f32 %v501_v12, %v318_v5  ;;  %v515_v21 = vadd.f32 %v499_v13, %v316_v7  ;;  %v321_v5 = vld [vmem:[%s1175_s13 + $0x28] sm:$0xff]  ;;  %v320_v12 = vld [vmem:[%s1175_s13 + $0x20] sm:$0xff]  ;;  %v625_v13 = vadd.s32 96, %v1121_v22 }
  0x94   : > { %v437_v26 = vpop.permute.xlu1 %436  ;;  %v427_v29 = vpop.permute.xlu0 %426 }
  0x95   : > { %v502_v36 = vmul.f32 %v437_v26, %v390_v52  ;;  %v500_v37 = vmul.f32 %v427_v29, %v388_v56  ;;  %v694_v50 = vsel %vm646_vm0, %v515_v21, 0.0  ;;  %v696_v63 = vsel %vm648_vm1, %v517_v20, 0.0 }
  0x96   : > { %v732_v6 = vmul.f32 %v694_v50, %v694_v50  ;;  %v734_v16 = vmul.f32 %v696_v63, %v696_v63 }
  0x97   : > { %v518_v51 = vadd.f32 %v502_v36, %v319_v27  ;;  %v516_v52 = vadd.f32 %v500_v37, %v317_v30  ;;  %v322_v27 = vld [vmem:[%s1175_s13 + $0x30] sm:$0xff]  ;;  %v1291_v37 = vadd.s32 %v1123_v24, %v626_v58  ;;  %v1307_v58 = vadd.s32 %v1123_v24, %v625_v13  ;;  %v327_v13 = vld [vmem:[%s1175_s13 + $0x58] sm:$0xff] }
  0x98   : > { %v447_v55 = vpop.permute.xlu1 %446  ;;  %v442_v56 = vpop.permute.xlu0 %441 }
  0x99   : > { %v989_v1 = vpack.c.bf16 %v518_v51, %v517_v20  ;;  %v984_v2 = vpack.c.bf16 %v516_v52, %v515_v21  ;;  %v695_v4 = vsel %vm647_vm2, %v516_v52, 0.0  ;;  %v504_v11 = vmul.f32 %v447_v55, %v392_v60  ;;  %v323_v21 = vld [vmem:[%s1175_s13 + $0x38] sm:$0xff] }
  0x9a   : > { %v710_v7 = vadd.f32 %v695_v4, %v694_v50  ;;  %v733_v10 = vmul.f32 %v695_v4, %v695_v4  ;;  %v697_v42 = vsel %vm649_vm3, %v518_v51, 0.0  ;;  %v503_v43 = vmul.f32 %v442_v56, %v391_v0 }
  0x9b   : > { %1028 = vst [vmem:[%s1258_s16 + $0x8] sm:$0xff] %v989_v1   ;;  %985 = vst [vmem:[%s1258_s16] sm:$0xff] %v984_v2   ;;  %v520_v60 = vadd.f32 %v504_v11, %v321_v5  ;;  %v1288_v0 = vadd.f32 %v980_v62, %v1129_v28  ;;  %v735_v29 = vmul.f32 %v697_v42, %v697_v42  ;;  %v325_v62 = vld [vmem:[%s1175_s13 + $0x48] sm:$0xff]  ;;  %v324_v1 = vld [vmem:[%s1175_s13 + $0x40] sm:$0xff]  ;;  %vm659_vm12 = vcmp.lt.s32.totalorder %v1291_v37, 256 }
  0x9c   : > { %v711_v18 = vadd.f32 %v710_v7, %v696_v63  ;;  %v748_v44 = vadd.f32 %v733_v10, %v732_v6  ;;  %v457_v20 = vpop.permute.xlu1 %456  ;;  %v452_v25 = vpop.permute.xlu0 %451  ;;  %v519_v46 = vadd.f32 %v503_v43, %v320_v12  ;;  %v1310_v2 = vadd.f32 %v979_v15, %v1129_v28 }
  0x9d   : > { %v506_v26 = vmul.f32 %v457_v20, %v394_v8  ;;  %v505_v47 = vmul.f32 %v452_v25, %v393_v31  ;;  %v699_v40 = vsel %vm651_vm4, %v520_v60, 0.0  ;;  %v628_v15 = vadd.s32 120, %v1121_v22 }
  0x9e   : > { %v749_v30 = vadd.f32 %v748_v44, %v734_v16  ;;  %v712_v36 = vadd.f32 %v711_v18, %v697_v42  ;;  %v994_v50 = vpack.c.bf16 %v520_v60, %v519_v46  ;;  %v698_v53 = vsel %vm650_vm5, %v519_v46, 0.0  ;;  %v326_v60 = vld [vmem:[%s1175_s13 + $0x50] sm:$0xff] }
  0x9f   : > { %v522_v8 = vadd.f32 %v506_v26, %v323_v21  ;;  %v736_v51 = vmul.f32 %v698_v53, %v698_v53  ;;  %v521_v55 = vadd.f32 %v505_v47, %v322_v27  ;;  %v737_v4 = vmul.f32 %v699_v40, %v699_v40 }
  0xa0   : > { %v713_v31 = vadd.f32 %v712_v36, %v698_v53  ;;  %v750_v52 = vadd.f32 %v749_v30, %v735_v29  ;;  %v467_v56 = vpop.permute.xlu1 %466  ;;  %v462_v63 = vpop.permute.xlu0 %461  ;;  %1029 = vst [vmem:[%s1258_s16 + $0x10] sm:$0xff] %v994_v50   ;;  %v402_v42 = vmax.f32 %v1288_v0, 0.0  ;;  %v627_v20 = vadd.s32 112, %v1121_v22  ;;  %v329_v29 = vld [vmem:[%s1175_s13 + $0x68] sm:$0xff]  ;;  %v328_v30 = vld [vmem:[%s1175_s13 + $0x60] sm:$0xff] }
  0xa1   : > { %v508_v57 = vmul.f32 %v467_v56, %v396_v32  ;;  %v507_v61 = vmul.f32 %v462_v63, %v395_v39  ;;  %v999_v6 = vpack.c.bf16 %v522_v8, %v521_v55  ;;  %v700_v7 = vsel %vm652_vm6, %v521_v55, 0.0  ;;  %v331_v55 = vld [vmem:[%s1175_s13 + $0x78] sm:$0xff] }
  0xa2   : > { %v751_v5 = vadd.f32 %v750_v52, %v736_v51  ;;  %v701_v3 = vsel %vm653_vm7, %v522_v8, 0.0  ;;  %v714_v32 = vadd.f32 %v713_v31, %v699_v40  ;;  %v738_v39 = vmul.f32 %v700_v7, %v700_v7 }
  0xa3   : > { %v524_v10 = vadd.f32 %v508_v57, %v325_v62  ;;  %v523_v9 = vadd.f32 %v507_v61, %v324_v1  ;;  %1030 = vst [vmem:[%s1258_s16 + $0x18] sm:$0xff] %v999_v6   ;;  %v739_v16 = vmul.f32 %v701_v3, %v701_v3  ;;  %vm658_vm13 = vcmp.lt.s32.totalorder %v1307_v58, 256 }
  0xa4   : > { %v752_v11 = vadd.f32 %v751_v5, %v737_v4  ;;  %v477_v28 = vpop.permute.xlu1 %476  ;;  %v472_v12 = vpop.permute.xlu0 %471  ;;  %v715_v23 = vadd.f32 %v714_v32, %v700_v7  ;;  %v401_v47 = vmax.f32 %v1310_v2, 0.0  ;;  %v645_v40 = vadd.s32 %v1123_v24, %v628_v15 }
  0xa5   : > { %v1004_v43 = vpack.c.bf16 %v524_v10, %v523_v9  ;;  %v702_v14 = vsel %vm654_vm8, %v523_v9, 0.0  ;;  %v510_v44 = vmul.f32 %v477_v28, %v398_v45  ;;  %v703_v21 = vsel %vm655_vm9, %v524_v10, 0.0 }
  0xa6   : > { %v753_v18 = vadd.f32 %v752_v11, %v738_v39  ;;  %v716_v25 = vadd.f32 %v715_v23, %v701_v3  ;;  %v509_v41 = vmul.f32 %v472_v12, %v397_v49  ;;  %v740_v46 = vmul.f32 %v702_v14, %v702_v14 }
  0xa7   : > { %1031 = vst [vmem:[%s1258_s16 + $0x20] sm:$0xff] %v1004_v43   ;;  %v526_v27 = vadd.f32 %v510_v44, %v327_v13  ;;  %v741_v49 = vmul.f32 %v703_v21, %v703_v21  ;;  %v644_v50 = vadd.s32 %v1123_v24, %v627_v20  ;;  %v330_v24 = vld [vmem:[%s1175_s13 + $0x70] sm:$0xff]  ;;  %vm661_vm15 = vcmp.lt.s32.totalorder %v645_v40, 256 }
  0xa8   : > { %v754_v26 = vadd.f32 %v753_v18, %v739_v16  ;;  %v487_v17 = vpop.permute.xlu1 %486  ;;  %v482_v45 = vpop.permute.xlu0 %481  ;;  %v717_v0 = vadd.f32 %v716_v25, %v702_v14  ;;  %v525_v22 = vadd.f32 %v509_v41, %v326_v60 }
  0xa9   : > { %v512_v38 = vmul.f32 %v487_v17, %v400_v35  ;;  %v511_v19 = vmul.f32 %v482_v45, %v399_v59  ;;  %v705_v53 = vsel %vm657_vm10, %v526_v27, 0.0  ;;  %vm660_vm14 = vcmp.lt.s32.totalorder %v644_v50, 256 }
  0xaa   : > { %v755_v36 = vadd.f32 %v754_v26, %v740_v46  ;;  %v1009_v8 = vpack.c.bf16 %v526_v27, %v525_v22  ;;  %v704_v33 = vsel %vm656_vm11, %v525_v22, 0.0  ;;  %v718_v35 = vadd.f32 %v717_v0, %v703_v21 }
  0xab   : > { %v742_v31 = vmul.f32 %v704_v33, %v704_v33  ;;  %v528_v34 = vadd.f32 %v512_v38, %v329_v29  ;;  %v527_v59 = vadd.f32 %v511_v19, %v328_v30  ;;  %v743_v48 = vmul.f32 %v705_v53, %v705_v53 }
  0xac   : > { %v756_v51 = vadd.f32 %v755_v36, %v741_v49  ;;  %v497_v52 = vpop.permute.xlu1 %496  ;;  %v492_v56 = vpop.permute.xlu0 %491  ;;  %1032 = vst [vmem:[%s1258_s16 + $0x28] sm:$0xff] %v1009_v8   ;;  %v719_v62 = vadd.f32 %v718_v35, %v704_v33 }
  0xad   : > { %v514_v63 = vmul.f32 %v497_v52, %v402_v42  ;;  %v513_v1 = vmul.f32 %v492_v56, %v401_v47  ;;  %v1014_v61 = vpack.c.bf16 %v528_v34, %v527_v59  ;;  %v706_v54 = vsel %vm658_vm13, %v527_v59, 0.0 }
  0xae   : > { %v757_v57 = vadd.f32 %v756_v51, %v742_v31  ;;  %v707_v2 = vsel %vm659_vm12, %v528_v34, 0.0  ;;  %v720_v4 = vadd.f32 %v719_v62, %v705_v53  ;;  %v744_v6 = vmul.f32 %v706_v54, %v706_v54 }
  0xaf   : > { %v530_v5 = vadd.f32 %v514_v63, %v331_v55  ;;  %1033 = vst [vmem:[%s1258_s16 + $0x30] sm:$0xff] %v1014_v61   ;;  %v529_v3 = vadd.f32 %v513_v1, %v330_v24  ;;  %v745_v10 = vmul.f32 %v707_v2, %v707_v2 }
  0xb0   : > { %v758_v7 = vadd.f32 %v757_v57, %v743_v48  ;;  %v721_v32 = vadd.f32 %v720_v4, %v706_v54 }
  0xb1   : > { %v1019_v39 = vpack.c.bf16 %v530_v5, %v529_v3  ;;  %v708_v11 = vsel %vm660_vm14, %v529_v3, 0.0  ;;  %v709_v58 = vsel %vm661_vm15, %v530_v5, 0.0 }
  0xb2   : > { %v759_v9 = vadd.f32 %v758_v7, %v744_v6  ;;  %v722_v28 = vadd.f32 %v721_v32, %v707_v2  ;;  %v746_v37 = vmul.f32 %v708_v11, %v708_v11  ;;  %v747_v23 = vmul.f32 %v709_v58, %v709_v58 }
  0xb3   : > { %1034 = vst [vmem:[%s1258_s16 + $0x38] sm:$0xff] %v1019_v39  }
  0xb4   : > { %v760_v12 = vadd.f32 %v759_v9, %v745_v10  ;;  %v723_v42 = vadd.f32 %v722_v28, %v708_v11 }
  0xb6   : > { %v761_v43 = vadd.f32 %v760_v12, %v746_v37  ;;  %v724_v14 = vadd.f32 %v723_v42, %v709_v58 }
  0xb8   : > { %v762_v13 = vadd.f32 %v761_v43, %v747_v23  ;;  %v725_v15 = vrot.slane %v724_v14, 4 }
  0xba   : > { %v763_v16 = vrot.slane %v762_v13, 4  ;;  %v726_v18 = vadd.f32 %v725_v15, %v724_v14 }
  0xbc   : > { %v764_v44 = vadd.f32 %v763_v16, %v762_v13  ;;  %v727_v60 = vrot.slane %v726_v18, 2 }
  0xbe   : > { %v765_v20 = vrot.slane %v764_v44, 2  ;;  %v728_v21 = vadd.f32 %v727_v60, %v726_v18 }
  0xc0   : > { %v766_v25 = vadd.f32 %v765_v20, %v764_v44  ;;  %v729_v41 = vrot.slane %v728_v21, 1 }
  0xc2   : > { %v767_v46 = vrot.slane %v766_v25, 1  ;;  %v730_v26 = vadd.f32 %v729_v41, %v728_v21 }
  0xc4   : > { %v768_v27 = vadd.f32 %v767_v46, %v766_v25  ;;  %731 = vst [vmem:[%s312_s19] sm:$0x1] %v730_v26 }
  0xc6   : > { %769 = vst [vmem:[%s315_s24] sm:$0x1] %v768_v27 }
  0xc7 PF: > { %s17_s21 = sadd.s32 1, %s1052_s21  }
  0xc8   : > { %p14_p5 = scmp.ge.s32.totalorder %s17_s21, 4  }
  0xca   :  { %16 = sbr.rel (!%p14_p5) target bundleno = 1 (0x1), region = 96 }

// kernel: gnn_node_forward.9
= control target key start
LH: loop header
LB: loop body
LE: loop exit
PB: predicated region body
PF: predicated region fallthrough
CT: control target
= control target key end

     0   :  { %s1609_s0 = inlined_call_operand.vmem [shape: s32[6], index: 0, kind: input, shape index: {}]   ;;  %s1610_s2 = inlined_call_operand.vmem [shape: bf16[768,128], index: 2, kind: input, shape index: {}]   ;;  %s1611_s3 = inlined_call_operand.vmem [shape: bf16[768,16], index: 3, kind: input, shape index: {}]   ;;  %s1612_s4 = inlined_call_operand.vmem [shape: f32[16,128], index: 4, kind: input, shape index: {}]   ;;  %s1613_s5 = inlined_call_operand.vmem [shape: f32[1,768], index: 5, kind: input, shape index: {}]   ;;  %s1614_s6 = inlined_call_operand.vmem [shape: s32[1,768], index: 6, kind: input, shape index: {}]   ;;  %s1615_s7 = inlined_call_operand.vmem [shape: f32[256,128], index: 7, kind: output, shape index: {}]   ;;  %s1616_s1 = inlined_call_operand.vmem [shape: s32[6], index: 1, kind: input, shape index: {}]  }
   0x1   :  { %s12_s26 = sshll.u32 %s1609_s0, 4  ;;  %s16_s29 = sshll.u32 %s1616_s1, 4  ;;  %s13_s26 = int_to_ptr.vmem [resolvable:$true] %s12_s26  ;;  %s17_s29 = int_to_ptr.vmem [resolvable:$true] %s16_s29 }
   0x2   :  { %s1306_s30 = scalar_lea.vmem %s13_s26, 16  ;;  %p1311_p1 = scmp.lt.s32.totalorder %s13_s26, %s13_s26 }
   0x3   :  { %p1307_p0 = scmp.ne.s32.totalorder %s13_s26, %s1306_s30  ;;  %p1312_p2 = scmp.lt.s32.totalorder %s1306_s30, %s1306_s30 }
   0x5   :  { %p1313_p3 = por %p1312_p2, %p1311_p1 }
   0x7   :  { %p1314_p4 = pnand %p1313_p3, %p1307_p0 }
   0x9   :  { %1317 = shalt.err (!%p1314_p4)  }
   0xa   :  { %s1340_s8 = smov [#allocation4]   ;;  %s1318_s9 = scalar_lea.vmem %s17_s29, 16 }
   0xb   :  { %15 = dma.vmem_to_smem %s13_s26, 16, %s1340_s8, [#allocation3] }
   0xc   :  { %p1319_p5 = scmp.ne.s32.totalorder %s17_s29, %s1318_s9  ;;  %p1323_p6 = scmp.lt.s32.totalorder %s17_s29, %s17_s29 }
   0xd   :  { %p1324_p7 = scmp.lt.s32.totalorder %s1318_s9, %s1318_s9 }
   0xf   :  { %p1325_p8 = por %p1324_p7, %p1323_p6 }
  0x11   :  { %p1326_p9 = pnand %p1325_p8, %p1319_p5 }
  0x13   :  { %1329 = shalt.err (!%p1326_p9)  }
  0x14   :  { %s1341_s0 = smov [#allocation5]  }
  0x15   :  { %19 = dma.vmem_to_smem %s17_s29, 16, %s1341_s0, [#allocation3] }
  0x16   :  { %1334 = dma.done.wait [#allocation3], 32 }
  0x17   :  { %1335 = vsyncadd [#allocation3], 4294967264 }
  0x18   :  { %21 = sfence }
  0x19   :  { %s1389_s1 = smov 0  }
  0x1a LB: > { %s983_s10 = sadd.s32 4294967295, %s1338_s1   ;;  %p987_p10 = scmp.ge.s32.totalorder %s1338_s1, 1  ;;  %s1338_s1 = sphi %s1389_s1, %s27_s1  }
  0x1b   : > { %p229_p11 = scmp.lt.s32.totalorder %s1338_s1, 7 }
  0x1d   : > { %p230_p12 = pnand %p987_p10, %p229_p11 }
  0x1e   : > { %s988_s11 = sshll.u32 (!%p230_p12), %s983_s10, 4  ;;  %p281_p13 = scmp.lt.s32.totalorder (!%p230_p12), %s983_s10, 5 }
  0x1f   : > { %233 = sbr.rel (%p230_p12) target bundleno = 543 (0x21f), region = 40  ;;  %p270_p0 = scmp.lt.s32.totalorder (!%p230_p12), %s988_s11, 95 }
  0x20   : > { %s287_s12 = sld [smem:[#allocation4 + %s983_s10]] (!%p230_p12) }
  0x21   : > { %s295_s21 = sld [smem:[#allocation5 + %s983_s10]] (!%p230_p12) }
  0x26   : > { %s1397_s13 = scalar_select %p281_p13, %s983_s10, 5 }
  0x27   : > { %s1618_s11 = smov (!%p270_p0, %s988_s11), 95  ;;  %s992_s28 = sshll.u32 %s287_s12, 4 }
  0x28   : > { %s283_s16 = scalar_lea.vmem %s1613_s5, %s1397_s13  ;;  %s286_s19 = scalar_lea.vmem %s1614_s6, %s1397_s13 }
  0x29   : > { %s989_s20 = sshll.u32 %s1618_s11, 2  ;;  %p289_p1 = scmp.lt.s32.totalorder %s992_s28, 31 }
  0x2a   : > { %s1410_s24 = scalar_lea.vmem %s1610_s2, %s989_s20  ;;  %s1415_s27 = scalar_lea.vmem %s1611_s3, %s989_s20 }
  0x2b   : > { %s1620_s28 = smov (!%p289_p1, %s992_s28), 31  ;;  %p994_p2 = scmp.ne.s32.totalorder %s295_s21, 1 }
  0x2c   : > { %s993_s29 = sshll.u32 %s1620_s28, 3  ;;  %v1342_v0 = vmov (!%p994_p2), 0.0  }
  0x2d   : > { %s1420_s9 = scalar_lea.vmem %s1615_s7, %s993_s29  ;;  %299 = sbr.rel (%p994_p2) target bundleno = 53 (0x35), region = 44  ;;  %300 = vst [vmem:[#allocation2] sm:$0xff] (!%p994_p2), %v1342_v0  ;;  %301 = vst [vmem:[#allocation2 + $0x8] sm:$0xff] (!%p994_p2), %v1342_v0 }
  0x2e   : > { %302 = vst [vmem:[#allocation2 + $0x10] sm:$0xff] (!%p994_p2), %v1342_v0  ;;  %303 = vst [vmem:[#allocation2 + $0x18] sm:$0xff] (!%p994_p2), %v1342_v0 }
  0x2f   : > { %304 = vst [vmem:[#allocation2 + $0x20] sm:$0xff] (!%p994_p2), %v1342_v0  ;;  %305 = vst [vmem:[#allocation2 + $0x28] sm:$0xff] (!%p994_p2), %v1342_v0 }
  0x30   : > { %306 = vst [vmem:[#allocation2 + $0x30] sm:$0xff] (!%p994_p2), %v1342_v0  ;;  %307 = vst [vmem:[#allocation2 + $0x38] sm:$0xff] (!%p994_p2), %v1342_v0 }
  0x31   : > { %308 = vst [vmem:[#allocation2 + $0x40] sm:$0xff] (!%p994_p2), %v1342_v0  ;;  %309 = vst [vmem:[#allocation2 + $0x48] sm:$0xff] (!%p994_p2), %v1342_v0 }
  0x32   : > { %310 = vst [vmem:[#allocation2 + $0x50] sm:$0xff] (!%p994_p2), %v1342_v0  ;;  %311 = vst [vmem:[#allocation2 + $0x58] sm:$0xff] (!%p994_p2), %v1342_v0 }
  0x33   : > { %312 = vst [vmem:[#allocation2 + $0x60] sm:$0xff] (!%p994_p2), %v1342_v0  ;;  %313 = vst [vmem:[#allocation2 + $0x68] sm:$0xff] (!%p994_p2), %v1342_v0 }
  0x34   : > { %314 = vst [vmem:[#allocation2 + $0x70] sm:$0xff] %v1342_v0  ;;  %315 = vst [vmem:[#allocation2 + $0x78] sm:$0xff] %v1342_v0 }
  0x35 PF: > { %v348_v1 = vld [vmem:[%s1612_s4] sm:$0xff]  ;;  %v349_v2 = vld [vmem:[%s1612_s4 + $0x8] sm:$0xff]  ;;  %vm350_vm0 = vcmask 130048   ;;  %v1096_v9 = vld [vmem:[%s1415_s27 + $0x10] sm:$0xff]   ;;  %v608_v28 = vlaneseq }
  0x36   : > { %v1032_v3 = vld [vmem:[%s1415_s27] sm:$0xff]   ;;  %v1243_v4 = vpack.c.bf16 %v349_v2, %v348_v1  ;;  %v1095_v6 = vld [vmem:[%s1415_s27 + $0x8] sm:$0xff]   ;;  %v1041_v11 = vunpack.c.l.bf16 %v1096_v9  ;;  %v1097_v12 = vld [vmem:[%s1415_s27 + $0x18] sm:$0xff]   ;;  %v1042_v13 = vunpack.c.h.bf16 %v1096_v9 }
  0x37   : > { %v1033_v5 = vunpack.c.l.bf16 %v1032_v3  ;;  %v1034_v7 = vunpack.c.h.bf16 %v1032_v3  ;;  %v1037_v8 = vunpack.c.l.bf16 %v1095_v6  ;;  %v1038_v10 = vunpack.c.h.bf16 %v1095_v6  ;;  %v1098_v15 = vld [vmem:[%s1415_s27 + $0x20] sm:$0xff]   ;;  %v1099_v18 = vld [vmem:[%s1415_s27 + $0x28] sm:$0xff]   ;;  %v1100_v21 = vld [vmem:[%s1415_s27 + $0x30] sm:$0xff]  }
  0x38   : > { %1244 = vmatprep.subr.bf16.mxu0 %v1243_v4  ;;  %v1045_v14 = vunpack.c.l.bf16 %v1097_v12  ;;  %v1046_v16 = vunpack.c.h.bf16 %v1097_v12  ;;  %v1049_v17 = vunpack.c.l.bf16 %v1098_v15  ;;  %v1050_v19 = vunpack.c.h.bf16 %v1098_v15  ;;  %v1101_v24 = vld [vmem:[%s1415_s27 + $0x38] sm:$0xff]   ;;  %v1457_v31 = vld [vmem:[%s286_s19] ss:$0 sm:$0xff]  ;;  %v1102_v50 = vld [vmem:[%s1410_s24 + $0x8] sm:$0xff]  }
  0x39   : > { %1163 = vmatprep.mubr.msk.f32.mxu0 %vm350_vm0, %v1033_v5  ;;  %1246 = vmatpush3.bf16.msra.mxu0 %v1243_v4  ;;  %v1053_v20 = vunpack.c.l.bf16 %v1099_v18  ;;  %v1054_v22 = vunpack.c.h.bf16 %v1099_v18  ;;  %v1057_v23 = vunpack.c.l.bf16 %v1100_v21  ;;  %v1058_v25 = vunpack.c.h.bf16 %v1100_v21  ;;  %v1464_v32 = vld [vmem:[%s283_s16] ss:$0 sm:$0xff]  ;;  %v1103_v57 = vld [vmem:[%s1410_s24 + $0x10] sm:$0xff]   ;;  %v1104_v3 = vld [vmem:[%s1410_s24 + $0x18] sm:$0xff]  }
  0x3a   : > { %v1061_v26 = vunpack.c.l.bf16 %v1101_v24  ;;  %v1062_v27 = vunpack.c.h.bf16 %v1101_v24  ;;  %v609_v29 = vshrl.u32 %v608_v28, 7  ;;  %v1064_v47 = vld [vmem:[%s1410_s24] sm:$0xff]   ;;  %v1070_v54 = vunpack.c.h.bf16 %v1102_v50 }
  0x3b   : > { %v1066_v48 = vunpack.c.h.bf16 %v1064_v47  ;;  %v1065_v49 = vunpack.c.l.bf16 %v1064_v47  ;;  %v1069_v56 = vunpack.c.l.bf16 %v1102_v50  ;;  %v1074_v63 = vunpack.c.h.bf16 %v1103_v57 }
  0x3c   : > { %1164 = vmatmul.mubr.msk.f32.vlgmr.msra.gmra.mrb[0].mxu0 %vm350_vm0, %v1034_v7  ;;  %v615_v30 = vadd.s32 48, %v609_v29  ;;  %v1466_v33 = vadd.s32 56, %v609_v29  ;;  %v1472_v34 = vadd.s32 64, %v609_v29  ;;  %v1474_v35 = vadd.s32 72, %v609_v29 }
  0x3d   : > { %1166 = vmatprep.mubr.msk.f32.mxu0 %vm350_vm0, %v1037_v8  ;;  %vm630_vm5 = vcmp.eq.s32.totalorder %v1457_v31, %v609_v29  ;;  %v1481_v36 = vadd.s32 8, %v609_v29  ;;  %v1483_v37 = vadd.s32 80, %v609_v29  ;;  %v1486_v38 = vadd.s32 88, %v609_v29 }
  0x3e   : > { %vm636_vm1 = vcmp.eq.s32.totalorder %v1457_v31, %v615_v30  ;;  %vm637_vm2 = vcmp.eq.s32.totalorder %v1457_v31, %v1466_v33  ;;  %vm638_vm3 = vcmp.eq.s32.totalorder %v1457_v31, %v1472_v34  ;;  %vm639_vm4 = vcmp.eq.s32.totalorder %v1457_v31, %v1474_v35  ;;  %v676_v33 = vld [vmem:[#allocation2 + $0x38] sm:$0xff]  ;;  %v670_v34 = vld [vmem:[#allocation2 + $0x8] sm:$0xff]  ;;  %v675_v35 = vld [vmem:[#allocation2 + $0x30] sm:$0xff] }
  0x3f   : > { %1228 = vmatprep.mubr.msk.f32.mxu1 %vm636_vm1, %v1464_v32  ;;  %vm631_vm6 = vcmp.eq.s32.totalorder %v1457_v31, %v1481_v36  ;;  %vm640_vm7 = vcmp.eq.s32.totalorder %v1457_v31, %v1483_v37  ;;  %vm641_vm8 = vcmp.eq.s32.totalorder %v1457_v31, %v1486_v38  ;;  %v1494_v39 = vadd.s32 16, %v609_v29  ;;  %v669_v36 = vld [vmem:[#allocation2] sm:$0xff] }
  0x40   : > { %1167 = vmatmul.mubr.msk.f32.gmra.mrb[2].mxu0 %vm350_vm0, %v1038_v10  ;;  %v1496_v40 = vadd.s32 24, %v609_v29  ;;  %v1498_v41 = vadd.s32 96, %v609_v29  ;;  %v1502_v42 = vadd.s32 104, %v609_v29  ;;  %v1510_v43 = vadd.s32 32, %v609_v29 }
  0x41   : > { %1169 = vmatprep.mubr.msk.f32.mxu0 %vm350_vm0, %v1041_v11  ;;  %vm632_vm9 = vcmp.eq.s32.totalorder %v1457_v31, %v1494_v39  ;;  %v1512_v44 = vadd.s32 40, %v609_v29  ;;  %v1514_v45 = vadd.s32 112, %v609_v29  ;;  %v1518_v46 = vadd.s32 120, %v609_v29 }
  0x42   : > { %vm633_vm10 = vcmp.eq.s32.totalorder %v1457_v31, %v1496_v40  ;;  %vm642_vm11 = vcmp.eq.s32.totalorder %v1457_v31, %v1498_v41  ;;  %vm643_vm12 = vcmp.eq.s32.totalorder %v1457_v31, %v1502_v42  ;;  %vm634_vm13 = vcmp.eq.s32.totalorder %v1457_v31, %v1510_v43 }
  0x43   : > { %vm635_vm14 = vcmp.eq.s32.totalorder %v1457_v31, %v1512_v44  ;;  %vm644_vm15 = vcmp.eq.s32.totalorder %v1457_v31, %v1514_v45  ;;  %v1073_v2 = vunpack.c.l.bf16 %v1103_v57  ;;  %v1078_v9 = vunpack.c.h.bf16 %v1104_v3  ;;  %v678_v44 = vld [vmem:[#allocation2 + $0x48] sm:$0xff] }
  0x44   : > { %1170 = vmatmul.mubr.msk.f32.gmra.mrb[4].mxu0 %vm350_vm0, %v1042_v13  ;;  %v1077_v12 = vunpack.c.l.bf16 %v1104_v3  ;;  %v1105_v13 = vld [vmem:[%s1410_s24 + $0x20] sm:$0xff]  }
  0x45   : > { %1172 = vmatprep.mubr.msk.f32.mxu0 %vm350_vm0, %v1045_v14 }
  0x48   : > { %1173 = vmatmul.mubr.msk.f32.gmra.mrb[6].mxu0 %vm350_vm0, %v1046_v16 }
  0x49   : > { %1175 = vmatprep.mubr.msk.f32.mxu0 %vm350_vm0, %v1049_v17 }
  0x4c   : > { %1176 = vmatmul.mubr.msk.f32.gmra.mrb[8].mxu0 %vm350_vm0, %v1050_v19  ;;  %v1082_v19 = vunpack.c.h.bf16 %v1105_v13 }
  0x4d   : > { %1178 = vmatprep.mubr.msk.f32.mxu0 %vm350_vm0, %v1053_v20 }
  0x50   : > { %1179 = vmatmul.mubr.msk.f32.gmra.mrb[10].mxu0 %vm350_vm0, %v1054_v22  ;;  %v1081_v22 = vunpack.c.l.bf16 %v1105_v13 }
  0x51   : > { %1181 = vmatprep.mubr.msk.f32.mxu0 %vm350_vm0, %v1057_v23  ;;  %v1106_v23 = vld [vmem:[%s1410_s24 + $0x28] sm:$0xff]  }
  0x52   : > { %v1086_v29 = vunpack.c.h.bf16 %v1106_v23 }
  0x54   : > { %1182 = vmatmul.mubr.msk.f32.gmra.mrb[12].mxu0 %vm350_vm0, %v1058_v25 }
  0x55   : > { %1184 = vmatprep.mubr.msk.f32.mxu0 %vm350_vm0, %v1061_v26 }
  0x58   : > { %1185 = vmatmul.mubr.msk.f32.gmra.mrb[14].mxu0 %vm350_vm0, %v1062_v27  ;;  %vm645_vm0 = vcmp.eq.s32.totalorder %v1457_v31, %v1518_v46  ;;  %v677_v31 = vld [vmem:[#allocation2 + $0x40] sm:$0xff] }
  0x59   : > { %1219 = vmatprep.mubr.msk.f32.mxu0 %vm630_vm5, %v1464_v32 }
 0x10f   : > { %v1165_v51 = vpop.f32.mrb[0].mxu0 }
 0x110   : > { %v577_v52 = vadd.f32 %v1165_v51, %v1066_v48  ;;  %v465_v53 = vpop.f32.mrb[1].mxu0  ;;  %v1085_v48 = vunpack.c.l.bf16 %v1106_v23 }
 0x111   : > { %v576_v55 = vadd.f32 %v1065_v49, %v465_v53  ;;  %v1107_v49 = vld [vmem:[%s1410_s24 + $0x30] sm:$0xff]  }
 0x112   : > { %v593_v58 = vmax.f32 %v577_v52, 0.0 }
 0x113   : > { %v592_v59 = vmax.f32 %v576_v55, 0.0  ;;  %v1168_v60 = vpop.f32.mrb[2].mxu0  ;;  %v1090_v55 = vunpack.c.h.bf16 %v1107_v49 }
 0x114   : > { %v579_v61 = vadd.f32 %v1168_v60, %v1070_v54  ;;  %v475_v62 = vpop.f32.mrb[3].mxu0 }
 0x115   : > { %v1247_v0 = vpack.c.bf16 %v593_v58, %v592_v59  ;;  %v578_v1 = vadd.f32 %v1069_v56, %v475_v62  ;;  %v1089_v58 = vunpack.c.l.bf16 %v1107_v49  ;;  %v1108_v59 = vld [vmem:[%s1410_s24 + $0x38] sm:$0xff]  }
 0x116   : > { %v595_v4 = vmax.f32 %v579_v61, 0.0 }
 0x117   : > { %v594_v5 = vmax.f32 %v578_v1, 0.0  ;;  %v1171_v6 = vpop.f32.mrb[4].mxu0  ;;  %1248 = vmatprep.subr.bf16.mxu0 %v1247_v0  ;;  %1279 = vmatprep.subr.bf16.mxu1 %v1247_v0  ;;  %v1094_v1 = vunpack.c.h.bf16 %v1108_v59 }
 0x118   : > { %v581_v7 = vadd.f32 %v1171_v6, %v1074_v63  ;;  %v485_v8 = vpop.f32.mrb[5].mxu0  ;;  %1250 = vmatpush3.bf16.msra.mxu0 %v1247_v0  ;;  %1287 = vmatpush3.bf16.msra.mxu1 %v1247_v0 }
 0x119   : > { %v1251_v10 = vpack.c.bf16 %v595_v4, %v594_v5  ;;  %v580_v11 = vadd.f32 %v1073_v2, %v485_v8  ;;  %v1093_v4 = vunpack.c.l.bf16 %v1108_v59 }
 0x11a   : > { %v597_v14 = vmax.f32 %v581_v7, 0.0 }
 0x11b   : > { %v596_v15 = vmax.f32 %v580_v11, 0.0  ;;  %v1174_v16 = vpop.f32.mrb[6].mxu0  ;;  %1252 = vmatprep.subr.bf16.mxu0 %v1251_v10  ;;  %1280 = vmatprep.subr.bf16.mxu1 %v1251_v10 }
 0x11c   : > { %v583_v17 = vadd.f32 %v1174_v16, %v1078_v9  ;;  %v495_v18 = vpop.f32.mrb[7].mxu0  ;;  %1254 = vmatpush3.bf16.msra.mxu0 %v1251_v10  ;;  %1288 = vmatpush3.bf16.msra.mxu1 %v1251_v10 }
 0x11d   : > { %v1255_v20 = vpack.c.bf16 %v597_v14, %v596_v15  ;;  %v582_v21 = vadd.f32 %v1077_v12, %v495_v18  ;;  %v672_v15 = vld [vmem:[#allocation2 + $0x18] sm:$0xff] }
 0x11e   : > { %v599_v24 = vmax.f32 %v583_v17, 0.0 }
 0x11f   : > { %v598_v25 = vmax.f32 %v582_v21, 0.0  ;;  %v1177_v26 = vpop.f32.mrb[8].mxu0  ;;  %1256 = vmatprep.subr.bf16.mxu0 %v1255_v20  ;;  %1281 = vmatprep.subr.bf16.mxu1 %v1255_v20 }
 0x120   : > { %v585_v27 = vadd.f32 %v1177_v26, %v1082_v19  ;;  %v505_v28 = vpop.f32.mrb[9].mxu0  ;;  %1258 = vmatpush3.bf16.msra.mxu0 %v1255_v20  ;;  %1289 = vmatpush3.bf16.msra.mxu1 %v1255_v20  ;;  %v673_v26 = vld [vmem:[#allocation2 + $0x20] sm:$0xff] }
 0x121   : > { %v1259_v30 = vpack.c.bf16 %v599_v24, %v598_v25  ;;  %v584_v47 = vadd.f32 %v1081_v22, %v505_v28  ;;  %v680_v22 = vld [vmem:[#allocation2 + $0x58] sm:$0xff]  ;;  %v674_v24 = vld [vmem:[#allocation2 + $0x28] sm:$0xff]  ;;  %v679_v25 = vld [vmem:[#allocation2 + $0x50] sm:$0xff] }
 0x122   : > { %v601_v50 = vmax.f32 %v585_v27, 0.0 }
 0x123   : > { %v600_v51 = vmax.f32 %v584_v47, 0.0  ;;  %v1180_v52 = vpop.f32.mrb[10].mxu0  ;;  %1260 = vmatprep.subr.bf16.mxu0 %v1259_v30  ;;  %1282 = vmatprep.subr.bf16.mxu1 %v1259_v30 }
 0x124   : > { %v587_v53 = vadd.f32 %v1180_v52, %v1086_v29  ;;  %v515_v54 = vpop.f32.mrb[11].mxu0  ;;  %1262 = vmatpush3.bf16.msra.mxu0 %v1259_v30  ;;  %1290 = vmatpush3.bf16.msra.mxu1 %v1259_v30  ;;  %v681_v52 = vld [vmem:[#allocation2 + $0x60] sm:$0xff] }
 0x125   : > { %v1263_v56 = vpack.c.bf16 %v601_v50, %v600_v51  ;;  %v586_v57 = vadd.f32 %v1085_v48, %v515_v54  ;;  %v682_v50 = vld [vmem:[#allocation2 + $0x68] sm:$0xff] }
 0x126   : > { %v603_v60 = vmax.f32 %v587_v53, 0.0 }
 0x127   : > { %v602_v61 = vmax.f32 %v586_v57, 0.0  ;;  %v1183_v62 = vpop.f32.mrb[12].mxu0  ;;  %1264 = vmatprep.subr.bf16.mxu0 %v1263_v56  ;;  %1283 = vmatprep.subr.bf16.mxu1 %v1263_v56  ;;  %v684_v57 = vld [vmem:[#allocation2 + $0x78] sm:$0xff] }
 0x128   : > { %v589_v63 = vadd.f32 %v1183_v62, %v1090_v55  ;;  %v525_v0 = vpop.f32.mrb[13].mxu0  ;;  %1266 = vmatpush3.bf16.msra.mxu0 %v1263_v56  ;;  %1291 = vmatpush3.bf16.msra.mxu1 %v1263_v56 }
 0x129   : > { %v1267_v2 = vpack.c.bf16 %v603_v60, %v602_v61  ;;  %v588_v3 = vadd.f32 %v1089_v58, %v525_v0  ;;  %v683_v58 = vld [vmem:[#allocation2 + $0x70] sm:$0xff] }
 0x12a   : > { %v605_v5 = vmax.f32 %v589_v63, 0.0 }
 0x12b   : > { %v604_v6 = vmax.f32 %v588_v3, 0.0  ;;  %v1186_v7 = vpop.f32.mrb[14].mxu0  ;;  %1268 = vmatprep.subr.bf16.mxu0 %v1267_v2  ;;  %1284 = vmatprep.subr.bf16.mxu1 %v1267_v2 }
 0x12c   : > { %v591_v8 = vadd.f32 %v1186_v7, %v1094_v1  ;;  %v535_v9 = vpop.f32.mrb[15].mxu0  ;;  %1270 = vmatpush3.bf16.msra.mxu0 %v1267_v2  ;;  %1292 = vmatpush3.bf16.msra.mxu1 %v1267_v2 }
 0x12d   : > { %v1271_v10 = vpack.c.bf16 %v605_v5, %v604_v6  ;;  %v590_v11 = vadd.f32 %v1093_v4, %v535_v9 }
 0x12e   : > { %v607_v12 = vmax.f32 %v591_v8, 0.0 }
 0x12f   : > { %v606_v13 = vmax.f32 %v590_v11, 0.0  ;;  %1272 = vmatprep.subr.bf16.mxu0 %v1271_v10  ;;  %1285 = vmatprep.subr.bf16.mxu1 %v1271_v10 }
 0x130   : > { %1274 = vmatpush3.bf16.msra.mxu0 %v1271_v10  ;;  %1293 = vmatpush3.bf16.msra.mxu1 %v1271_v10 }
 0x131   : > { %v1275_v14 = vpack.c.bf16 %v607_v12, %v606_v13 }
 0x133   : > { %1276 = vmatprep.subr.bf16.mxu0 %v1275_v14  ;;  %1286 = vmatprep.subr.bf16.mxu1 %v1275_v14 }
 0x134   : > { %1278 = vmatpush3.bf16.msra.mxu0 %v1275_v14  ;;  %1294 = vmatpush3.bf16.msra.mxu1 %v1275_v14 }
 0x137   : > { %1229 = vmatmul.mubr.msk.f32.vlgmr.msra.gmra.mrb[0].mxu1 %vm637_vm2, %v1464_v32  ;;  %1220 = vmatmul.mubr.msk.f32.vlgmr.msra.gmra.mrb[16].mxu0 %vm631_vm6, %v1464_v32 }
 0x138   : > { %1231 = vmatprep.mubr.msk.f32.mxu1 %vm638_vm3, %v1464_v32  ;;  %1222 = vmatprep.mubr.msk.f32.mxu0 %vm632_vm9, %v1464_v32 }
 0x13b   : > { %1232 = vmatmul.mubr.msk.f32.gmra.mrb[2].mxu1 %vm639_vm4, %v1464_v32  ;;  %1223 = vmatmul.mubr.msk.f32.gmra.mrb[18].mxu0 %vm633_vm10, %v1464_v32 }
 0x13c   : > { %1234 = vmatprep.mubr.msk.f32.mxu1 %vm640_vm7, %v1464_v32  ;;  %1225 = vmatprep.mubr.msk.f32.mxu0 %vm634_vm13, %v1464_v32 }
 0x13f   : > { %1235 = vmatmul.mubr.msk.f32.gmra.mrb[4].mxu1 %vm641_vm8, %v1464_v32  ;;  %1226 = vmatmul.mubr.msk.f32.gmra.mrb[20].mxu0 %vm635_vm14, %v1464_v32 }
 0x140   : > { %1237 = vmatprep.mubr.msk.f32.mxu1 %vm642_vm11, %v1464_v32 }
 0x143   : > { %1238 = vmatmul.mubr.msk.f32.gmra.mrb[6].mxu1 %vm643_vm12, %v1464_v32 }
 0x144   : > { %1240 = vmatprep.mubr.msk.f32.mxu1 %vm644_vm15, %v1464_v32 }
 0x147   : > { %1241 = vmatmul.mubr.msk.f32.gmra.mrb[8].mxu1 %vm645_vm0, %v1464_v32  ;;  %v671_v32 = vld [vmem:[#allocation2 + $0x10] sm:$0xff] }
 0x20a   : > { %v1230_v37 = vpop.f32.mrb[0].mxu1  ;;  %v1221_v38 = vpop.f32.mrb[16].mxu0 }
 0x20b   : > { %v837_v39 = vadd.f32 %v1230_v37, %v676_v33  ;;  %v781_v40 = vpop.f32.mrb[1].mxu1  ;;  %v831_v41 = vadd.f32 %v1221_v38, %v670_v34  ;;  %v751_v42 = vpop.f32.mrb[17].mxu0 }
 0x20c   : > { %v836_v43 = vadd.f32 %v781_v40, %v675_v35  ;;  %v830_v45 = vadd.f32 %v751_v42, %v669_v36 }
 0x20d   : > { %853 = vst [vmem:[#allocation2 + $0x38] sm:$0xff] %v837_v39  ;;  %885 = vst [vmem:[%s1420_s9 + $0x38] sm:$0xff] %v837_v39 }
 0x20e   : > { %847 = vst [vmem:[#allocation2 + $0x8] sm:$0xff] %v831_v41  ;;  %879 = vst [vmem:[%s1420_s9 + $0x8] sm:$0xff] %v831_v41  ;;  %v1233_v46 = vpop.f32.mrb[2].mxu1  ;;  %v1224_v16 = vpop.f32.mrb[18].mxu0 }
 0x20f   : > { %852 = vst [vmem:[#allocation2 + $0x30] sm:$0xff] %v836_v43  ;;  %884 = vst [vmem:[%s1420_s9 + $0x30] sm:$0xff] %v836_v43  ;;  %v839_v17 = vadd.f32 %v1233_v46, %v678_v44  ;;  %v791_v18 = vpop.f32.mrb[3].mxu1  ;;  %v833_v19 = vadd.f32 %v1224_v16, %v672_v15  ;;  %v761_v20 = vpop.f32.mrb[19].mxu0 }
 0x210   : > { %846 = vst [vmem:[#allocation2] sm:$0xff] %v830_v45  ;;  %878 = vst [vmem:[%s1420_s9] sm:$0xff] %v830_v45  ;;  %v838_v21 = vadd.f32 %v791_v18, %v677_v31  ;;  %v832_v23 = vadd.f32 %v761_v20, %v671_v32 }
 0x211   : > { %855 = vst [vmem:[#allocation2 + $0x48] sm:$0xff] %v839_v17  ;;  %887 = vst [vmem:[%s1420_s9 + $0x48] sm:$0xff] %v839_v17 }
 0x212   : > { %849 = vst [vmem:[#allocation2 + $0x18] sm:$0xff] %v833_v19  ;;  %881 = vst [vmem:[%s1420_s9 + $0x18] sm:$0xff] %v833_v19  ;;  %v1236_v27 = vpop.f32.mrb[4].mxu1  ;;  %v1227_v28 = vpop.f32.mrb[20].mxu0 }
 0x213   : > { %854 = vst [vmem:[#allocation2 + $0x40] sm:$0xff] %v838_v21  ;;  %886 = vst [vmem:[%s1420_s9 + $0x40] sm:$0xff] %v838_v21  ;;  %v841_v29 = vadd.f32 %v1236_v27, %v680_v22  ;;  %v801_v30 = vpop.f32.mrb[5].mxu1  ;;  %v835_v47 = vadd.f32 %v1227_v28, %v674_v24  ;;  %v771_v48 = vpop.f32.mrb[21].mxu0 }
 0x214   : > { %848 = vst [vmem:[#allocation2 + $0x10] sm:$0xff] %v832_v23  ;;  %880 = vst [vmem:[%s1420_s9 + $0x10] sm:$0xff] %v832_v23  ;;  %v840_v49 = vadd.f32 %v801_v30, %v679_v25  ;;  %v834_v51 = vadd.f32 %v771_v48, %v673_v26 }
 0x215   : > { %857 = vst [vmem:[#allocation2 + $0x58] sm:$0xff] %v841_v29  ;;  %889 = vst [vmem:[%s1420_s9 + $0x58] sm:$0xff] %v841_v29 }
 0x216   : > { %851 = vst [vmem:[#allocation2 + $0x28] sm:$0xff] %v835_v47  ;;  %883 = vst [vmem:[%s1420_s9 + $0x28] sm:$0xff] %v835_v47  ;;  %v1239_v53 = vpop.f32.mrb[6].mxu1 }
 0x217   : > { %856 = vst [vmem:[#allocation2 + $0x50] sm:$0xff] %v840_v49  ;;  %888 = vst [vmem:[%s1420_s9 + $0x50] sm:$0xff] %v840_v49  ;;  %v843_v54 = vadd.f32 %v1239_v53, %v682_v50  ;;  %v811_v55 = vpop.f32.mrb[7].mxu1 }
 0x218   : > { %850 = vst [vmem:[#allocation2 + $0x20] sm:$0xff] %v834_v51  ;;  %882 = vst [vmem:[%s1420_s9 + $0x20] sm:$0xff] %v834_v51  ;;  %v842_v56 = vadd.f32 %v811_v55, %v681_v52 }
 0x219   : > { %859 = vst [vmem:[#allocation2 + $0x68] sm:$0xff] %v843_v54  ;;  %891 = vst [vmem:[%s1420_s9 + $0x68] sm:$0xff] %v843_v54 }
 0x21a   : > { %858 = vst [vmem:[#allocation2 + $0x60] sm:$0xff] %v842_v56  ;;  %890 = vst [vmem:[%s1420_s9 + $0x60] sm:$0xff] %v842_v56  ;;  %v1242_v59 = vpop.f32.mrb[8].mxu1 }
 0x21b   : > { %v845_v60 = vadd.f32 %v1242_v59, %v684_v57  ;;  %v821_v61 = vpop.f32.mrb[9].mxu1 }
 0x21c   : > { %v844_v62 = vadd.f32 %v821_v61, %v683_v58 }
 0x21d   : > { %861 = vst [vmem:[#allocation2 + $0x78] sm:$0xff] %v845_v60  ;;  %893 = vst [vmem:[%s1420_s9 + $0x78] sm:$0xff] %v845_v60 }
 0x21e   : > { %860 = vst [vmem:[#allocation2 + $0x70] sm:$0xff] %v844_v62  ;;  %892 = vst [vmem:[%s1420_s9 + $0x70] sm:$0xff] %v844_v62 }
 0x21f PF: > { %s27_s1 = sadd.s32 1, %s1338_s1  }
 0x220   : > { %p24_p3 = scmp.ge.s32.totalorder %s27_s1, 8  }
 0x222   :  { %26 = sbr.rel (!%p24_p3) target bundleno = 26 (0x1a), region = 83 }

// kernel: gnn_node_forward.11
= control target key start
LH: loop header
LB: loop body
LE: loop exit
PB: predicated region body
PF: predicated region fallthrough
CT: control target
= control target key end

     0   :  { %s769_s18 = smov 0   ;;  %s926_s0 = inlined_call_operand.vmem [shape: bf16[256,128], index: 0, kind: input, shape index: {}]   ;;  %s927_s1 = inlined_call_operand.vmem [shape: f32[1,128], index: 1, kind: input, shape index: {}]   ;;  %s928_s2 = inlined_call_operand.vmem [shape: f32[1,128], index: 2, kind: input, shape index: {}]   ;;  %s929_s3 = inlined_call_operand.vmem [shape: f32[256,128], index: 3, kind: input, shape index: {}, may-alias: {3,5}]   ;;  %s930_s4 = inlined_call_operand.vmem [shape: bf16[256,128], index: 4, kind: output, shape index: {0}]   ;;  %s931_s5 = inlined_call_operand.vmem [shape: f32[256,128], index: 5, kind: output, shape index: {1}, may-alias: {3,5}]  }
   0x1 LB: > { %s588_s19 = sadd.s32 4294967295, %s737_s18   ;;  %p592_p0 = scmp.ge.s32.totalorder %s737_s18, 1  ;;  %s737_s18 = sphi %s769_s18, %s16_s18  }
   0x2   : > { %p202_p1 = scmp.lt.s32.totalorder %s737_s18, 3 }
   0x4   : > { %p203_p2 = pnand %p592_p0, %p202_p1 }
   0x5   : > { %s593_s20 = sshll.u32 (!%p203_p2), %s588_s19, 4  ;;  %v792_v1 = vld [vmem:[%s927_s1] ss:$0 sm:$0xff] (!%p203_p2) }
   0x6   : > { %206 = sbr.rel (%p203_p2) target bundleno = 44 (0x2c), region = 36  ;;  %p241_p3 = scmp.lt.s32.totalorder (!%p203_p2), %s593_s20, 31  ;;  %v805_v5 = vld [vmem:[%s928_s2] ss:$0 sm:$0xff] (!%p203_p2) }
   0xd   : > { %s933_s20 = smov (!%p241_p3, %s593_s20), 31 }
   0xe   : > { %s594_s21 = sshll.u32 %s933_s20, 2  ;;  %s596_s25 = sshll.u32 %s933_s20, 3 }
   0xf   : > { %s785_s24 = scalar_lea.vmem %s926_s0, %s594_s21  ;;  %s800_s30 = scalar_lea.vmem %s929_s3, %s596_s25 }
  0x10   : > { %v638_v0 = vld [vmem:[%s785_s24] sm:$0xff]   ;;  %v709_v4 = vld [vmem:[%s785_s24 + $0x8] sm:$0xff]   ;;  %v710_v8 = vld [vmem:[%s785_s24 + $0x10] sm:$0xff]   ;;  %s835_s10 = scalar_lea.vmem %s930_s4, %s594_s21  ;;  %s842_s13 = scalar_lea.vmem %s931_s5, %s596_s25 }
  0x11   : > { %v639_v2 = vunpack.c.l.bf16 %v638_v0  ;;  %v640_v3 = vunpack.c.h.bf16 %v638_v0  ;;  %v643_v6 = vunpack.c.l.bf16 %v709_v4  ;;  %v644_v7 = vunpack.c.h.bf16 %v709_v4  ;;  %v711_v13 = vld [vmem:[%s785_s24 + $0x18] sm:$0xff]   ;;  %v438_v20 = vld [vmem:[%s800_s30] sm:$0xff]  ;;  %v439_v23 = vld [vmem:[%s800_s30 + $0x8] sm:$0xff] }
  0x12   : > { %v647_v11 = vunpack.c.l.bf16 %v710_v8  ;;  %v648_v12 = vunpack.c.h.bf16 %v710_v8  ;;  %v651_v16 = vunpack.c.l.bf16 %v711_v13  ;;  %v652_v17 = vunpack.c.h.bf16 %v711_v13  ;;  %v440_v26 = vld [vmem:[%s800_s30 + $0x10] sm:$0xff]  ;;  %v441_v27 = vld [vmem:[%s800_s30 + $0x18] sm:$0xff]  ;;  %v442_v34 = vld [vmem:[%s800_s30 + $0x20] sm:$0xff] }
  0x13   : > { %v303_v9 = vmul.f32 %v639_v2, %v792_v1  ;;  %v304_v10 = vmul.f32 %v640_v3, %v792_v1  ;;  %v305_v14 = vmul.f32 %v643_v6, %v792_v1  ;;  %v306_v15 = vmul.f32 %v644_v7, %v792_v1  ;;  %v443_v35 = vld [vmem:[%s800_s30 + $0x28] sm:$0xff]  ;;  %v712_v36 = vld [vmem:[%s785_s24 + $0x20] sm:$0xff]   ;;  %v444_v41 = vld [vmem:[%s800_s30 + $0x30] sm:$0xff] }
  0x14   : > { %v307_v21 = vmul.f32 %v647_v11, %v792_v1  ;;  %v308_v22 = vmul.f32 %v648_v12, %v792_v1  ;;  %v309_v28 = vmul.f32 %v651_v16, %v792_v1  ;;  %v310_v29 = vmul.f32 %v652_v17, %v792_v1  ;;  %v445_v42 = vld [vmem:[%s800_s30 + $0x38] sm:$0xff]  ;;  %v849_v43 = vld [vmem:[%s800_s30 + $0x40] sm:$0xff]  ;;  %v852_v44 = vld [vmem:[%s800_s30 + $0x48] sm:$0xff] }
  0x15   : > { %v326_v18 = vadd.f32 %v805_v5, %v303_v9  ;;  %v327_v19 = vadd.f32 %v805_v5, %v304_v10  ;;  %v328_v24 = vadd.f32 %v805_v5, %v305_v14  ;;  %v329_v25 = vadd.f32 %v805_v5, %v306_v15  ;;  %v713_v45 = vld [vmem:[%s785_s24 + $0x28] sm:$0xff]   ;;  %v856_v50 = vld [vmem:[%s800_s30 + $0x50] sm:$0xff]  ;;  %v859_v51 = vld [vmem:[%s800_s30 + $0x58] sm:$0xff] }
  0x16   : > { %v330_v32 = vadd.f32 %v805_v5, %v307_v21  ;;  %v331_v33 = vadd.f32 %v805_v5, %v308_v22  ;;  %v332_v39 = vadd.f32 %v805_v5, %v309_v28  ;;  %v333_v40 = vadd.f32 %v805_v5, %v310_v29  ;;  %v862_v52 = vld [vmem:[%s800_s30 + $0x60] sm:$0xff]  ;;  %v865_v57 = vld [vmem:[%s800_s30 + $0x68] sm:$0xff]  ;;  %v868_v58 = vld [vmem:[%s800_s30 + $0x70] sm:$0xff] }
  0x17   : > { %v342_v30 = vmax.f32 %v326_v18, 0.0  ;;  %v343_v31 = vmax.f32 %v327_v19, 0.0  ;;  %v344_v37 = vmax.f32 %v328_v24, 0.0  ;;  %v345_v38 = vmax.f32 %v329_v25, 0.0  ;;  %v871_v59 = vld [vmem:[%s800_s30 + $0x78] sm:$0xff]  ;;  %v714_v0 = vld [vmem:[%s785_s24 + $0x30] sm:$0xff]  }
  0x18   : > { %v346_v49 = vmax.f32 %v330_v32, 0.0  ;;  %v347_v56 = vmax.f32 %v331_v33, 0.0  ;;  %v348_v61 = vmax.f32 %v332_v39, 0.0  ;;  %v349_v62 = vmax.f32 %v333_v40, 0.0  ;;  %v715_v7 = vld [vmem:[%s785_s24 + $0x38] sm:$0xff]  }
  0x19   : > { %v672_v46 = vpack.c.bf16 %v343_v31, %v342_v30  ;;  %v454_v47 = vadd.f32 %v438_v20, %v342_v30  ;;  %v455_v48 = vadd.f32 %v439_v23, %v343_v31  ;;  %v677_v53 = vpack.c.bf16 %v345_v38, %v344_v37 }
  0x1a   : > { %v456_v54 = vadd.f32 %v440_v26, %v344_v37  ;;  %v457_v55 = vadd.f32 %v441_v27, %v345_v38  ;;  %v458_v60 = vadd.f32 %v442_v34, %v346_v49  ;;  %v655_v63 = vunpack.c.l.bf16 %v712_v36 }
  0x1b   : > { %673 = vst [vmem:[%s835_s10] sm:$0xff] %v672_v46   ;;  %470 = vst [vmem:[%s842_s13] sm:$0xff] %v454_v47  ;;  %v682_v2 = vpack.c.bf16 %v347_v56, %v346_v49  ;;  %v459_v3 = vadd.f32 %v443_v35, %v347_v56  ;;  %v656_v4 = vunpack.c.h.bf16 %v712_v36  ;;  %v659_v6 = vunpack.c.l.bf16 %v713_v45 }
  0x1c   : > { %471 = vst [vmem:[%s842_s13 + $0x8] sm:$0xff] %v455_v48  ;;  %716 = vst [vmem:[%s835_s10 + $0x8] sm:$0xff] %v677_v53   ;;  %v687_v8 = vpack.c.bf16 %v349_v62, %v348_v61  ;;  %v460_v9 = vadd.f32 %v444_v41, %v348_v61  ;;  %v461_v10 = vadd.f32 %v445_v42, %v349_v62  ;;  %v660_v13 = vunpack.c.h.bf16 %v713_v45 }
  0x1d   : > { %472 = vst [vmem:[%s842_s13 + $0x10] sm:$0xff] %v456_v54  ;;  %473 = vst [vmem:[%s842_s13 + $0x18] sm:$0xff] %v457_v55  ;;  %v311_v11 = vmul.f32 %v655_v63, %v792_v1  ;;  %v312_v12 = vmul.f32 %v656_v4, %v792_v1  ;;  %v313_v14 = vmul.f32 %v659_v6, %v792_v1  ;;  %v663_v15 = vunpack.c.l.bf16 %v714_v0 }
  0x1e   : > { %474 = vst [vmem:[%s842_s13 + $0x20] sm:$0xff] %v458_v60  ;;  %717 = vst [vmem:[%s835_s10 + $0x10] sm:$0xff] %v682_v2   ;;  %v664_v17 = vunpack.c.h.bf16 %v714_v0  ;;  %v667_v18 = vunpack.c.l.bf16 %v715_v7  ;;  %v668_v19 = vunpack.c.h.bf16 %v715_v7  ;;  %v314_v21 = vmul.f32 %v660_v13, %v792_v1 }
  0x1f   : > { %475 = vst [vmem:[%s842_s13 + $0x28] sm:$0xff] %v459_v3  ;;  %718 = vst [vmem:[%s835_s10 + $0x18] sm:$0xff] %v687_v8   ;;  %v334_v16 = vadd.f32 %v805_v5, %v311_v11  ;;  %v335_v20 = vadd.f32 %v805_v5, %v312_v12  ;;  %v336_v22 = vadd.f32 %v805_v5, %v313_v14 }
  0x20   : > { %476 = vst [vmem:[%s842_s13 + $0x30] sm:$0xff] %v460_v9  ;;  %477 = vst [vmem:[%s842_s13 + $0x38] sm:$0xff] %v461_v10  ;;  %v315_v23 = vmul.f32 %v663_v15, %v792_v1  ;;  %v316_v25 = vmul.f32 %v664_v17, %v792_v1  ;;  %v317_v26 = vmul.f32 %v667_v18, %v792_v1 }
  0x21   : > { %v350_v24 = vmax.f32 %v334_v16, 0.0  ;;  %v318_v27 = vmul.f32 %v668_v19, %v792_v1  ;;  %v351_v28 = vmax.f32 %v335_v20, 0.0  ;;  %v337_v29 = vadd.f32 %v805_v5, %v314_v21 }
  0x22   : > { %v352_v30 = vmax.f32 %v336_v22, 0.0  ;;  %v338_v31 = vadd.f32 %v805_v5, %v315_v23  ;;  %v339_v33 = vadd.f32 %v805_v5, %v316_v25  ;;  %v340_v34 = vadd.f32 %v805_v5, %v317_v26 }
  0x23   : > { %v462_v32 = vadd.f32 %v849_v43, %v350_v24  ;;  %v341_v35 = vadd.f32 %v805_v5, %v318_v27  ;;  %v692_v36 = vpack.c.bf16 %v351_v28, %v350_v24  ;;  %v463_v1 = vadd.f32 %v852_v44, %v351_v28 }
  0x24   : > { %v353_v37 = vmax.f32 %v337_v29, 0.0  ;;  %v464_v38 = vadd.f32 %v856_v50, %v352_v30  ;;  %v354_v39 = vmax.f32 %v338_v31, 0.0  ;;  %v355_v40 = vmax.f32 %v339_v33, 0.0 }
  0x25   : > { %v356_v41 = vmax.f32 %v340_v34, 0.0  ;;  %v357_v42 = vmax.f32 %v341_v35, 0.0  ;;  %478 = vst [vmem:[%s842_s13 + $0x40] sm:$0xff] %v462_v32  ;;  %719 = vst [vmem:[%s835_s10 + $0x20] sm:$0xff] %v692_v36  }
  0x26   : > { %v697_v43 = vpack.c.bf16 %v353_v37, %v352_v30  ;;  %v465_v5 = vadd.f32 %v859_v51, %v353_v37  ;;  %479 = vst [vmem:[%s842_s13 + $0x48] sm:$0xff] %v463_v1  ;;  %480 = vst [vmem:[%s842_s13 + $0x50] sm:$0xff] %v464_v38  ;;  %v702_v44 = vpack.c.bf16 %v355_v40, %v354_v39 }
  0x27   : > { %v466_v45 = vadd.f32 %v862_v52, %v354_v39  ;;  %v467_v46 = vadd.f32 %v865_v57, %v355_v40  ;;  %v707_v47 = vpack.c.bf16 %v357_v42, %v356_v41  ;;  %v468_v48 = vadd.f32 %v868_v58, %v356_v41 }
  0x28   : > { %720 = vst [vmem:[%s835_s10 + $0x28] sm:$0xff] %v697_v43   ;;  %v469_v49 = vadd.f32 %v871_v59, %v357_v42  ;;  %481 = vst [vmem:[%s842_s13 + $0x58] sm:$0xff] %v465_v5 }
  0x29   : > { %721 = vst [vmem:[%s835_s10 + $0x30] sm:$0xff] %v702_v44   ;;  %722 = vst [vmem:[%s835_s10 + $0x38] sm:$0xff] %v707_v47  }
  0x2a   : > { %482 = vst [vmem:[%s842_s13 + $0x60] sm:$0xff] %v466_v45  ;;  %483 = vst [vmem:[%s842_s13 + $0x68] sm:$0xff] %v467_v46 }
  0x2b   : > { %484 = vst [vmem:[%s842_s13 + $0x70] sm:$0xff] %v468_v48  ;;  %485 = vst [vmem:[%s842_s13 + $0x78] sm:$0xff] %v469_v49 }
  0x2c PF: > { %s16_s18 = sadd.s32 1, %s737_s18  }
  0x2d   : > { %p13_p4 = scmp.ge.s32.totalorder %s16_s18, 4  }
  0x2f   :  { %15 = sbr.rel (!%p13_p4) target bundleno = 1 (0x1), region = 81 }

// kernel: gnn_node_forward.15
= control target key start
LH: loop header
LB: loop body
LE: loop exit
PB: predicated region body
PF: predicated region fallthrough
CT: control target
= control target key end

     0   :  { %11 = vsyncpa [#allocation3], 0  ;;  %s1102_s0 = inlined_call_operand.vmem [shape: bf16[256,128], index: 0, kind: input, shape index: {}]   ;;  %s1103_s1 = inlined_call_operand.vmem [shape: f32[1,128], index: 1, kind: input, shape index: {}]   ;;  %s1104_s2 = inlined_call_operand.vmem [shape: f32[1,128], index: 2, kind: input, shape index: {}]   ;;  %s1105_s3 = inlined_call_operand.vmem [shape: f32[256,128], index: 3, kind: input, shape index: {}, may-alias: {3,5}]   ;;  %s1106_s4 = inlined_call_operand.hbm [shape: bf16[256,128], index: 4, kind: output, shape index: {0}]   ;;  %s1107_s5 = inlined_call_operand.vmem [shape: f32[256,128], index: 5, kind: output, shape index: {1}, may-alias: {3,5}]  }
   0x1   :  { %13 = vsyncpa [#allocation3 + $0x1], 0  ;;  %s865_s18 = smov 0   ;;  %s867_s19 = smov 0  }
   0x2   :  { %s869_s20 = smov 0   ;;  %s871_s21 = smov 0  }
   0x3 LB: > { %s886_s22 = sadd.s32 4294967295, %s830_s21   ;;  %s590_s23 = sadd.s32 4294967294, %s830_s21   ;;  %s830_s21 = sphi %s871_s21, %s1113_s21   ;;  %s826_s20 = sphi %s869_s20, %s1112_s20   ;;  %s822_s19 = sphi %s867_s19, %s1111_s19   ;;  %s818_s18 = sphi %s865_s18, %s1110_s18  }
   0x4   : > { %s890_s24 = sadd.s32 1, %s830_s21   ;;  %s120_s25 = sadd.s32 1, %s826_s20 }
   0x5   : > { %s117_s26 = ssub.s32 %s830_s21, %s890_s24  ;;  %p130_p0 = scmp.ne.s32.totalorder %s826_s20, %s822_s19 }
   0x6   : > { %p118_p1 = scmp.eq.s32.totalorder %s117_s26, 0  ;;  %p131_p2 = scmp.eq.s32.totalorder %s886_s22, 1 }
   0x7   : > { %p136_p3 = scmp.ne.s32.totalorder %s822_s19, %s818_s18  ;;  %p137_p4 = scmp.eq.s32.totalorder %s590_s23, 1 }
   0x8   : > { %s901_s27 = scalar_select %p118_p1, %s826_s20, %s120_s25  }
   0x9   : > { %p903_p5 = por %p131_p2, %p130_p0  ;;  %p907_p6 = por %p137_p4, %p136_p3 }
   0xa   : > { %p593_p7 = scmp.ge.s32.totalorder %s830_s21, 1  ;;  %p205_p8 = scmp.lt.s32.totalorder %s830_s21, 3 }
   0xc   : > { %p206_p9 = pnand %p593_p7, %p205_p8 }
   0xd   : > { %s595_s30 = sshll.u32 (!%p206_p9), %s886_s22, 4  ;;  %s233_s11 = sand.u32 (!%p206_p9), 1, %s822_s19   ;;  %v935_v1 = vld [vmem:[%s1103_s1] ss:$0 sm:$0xff] (!%p206_p9) }
   0xe   : > { %209 = sbr.rel (%p206_p9) target bundleno = 62 (0x3e), region = 36  ;;  %p244_p10 = scmp.lt.s32.totalorder (!%p206_p9), %s595_s30, 31  ;;  %v941_v5 = vld [vmem:[%s1104_s2] ss:$0 sm:$0xff] (!%p206_p9) }
   0xf   : > { %s946_s25 = sshll.u32 (!%p206_p9), %s233_s11, 6  ;;  %s640_s9 = sshll.u32 (!%p206_p9), %s886_s22, 10 }
  0x10   : > { %s1045_s12 = scalar_lea.hbm (!%p206_p9), %s1106_s4, %s640_s9  ;;  %s1061_s13 = scalar_lea.sflag (!%p206_p9), [#allocation3], %s233_s11 }
  0x11   : > { %s832_s15 = smov (!%p206_p9), [#allocation2]  }
  0x12   : > { %s772_s16 = sshll.u32 (!%p206_p9), %s832_s15, 4  ;;  %s773_s16 = int_to_ptr.vmem [resolvable:$false] %s772_s16 }
  0x13   : > { %s774_s17 = scalar_lea.vmem (!%p206_p9), %s773_s16, 2048 }
  0x15   : > { %s1115_s30 = smov (!%p244_p10, %s595_s30), 31 }
  0x16   : > { %s596_s6 = sshll.u32 %s1115_s30, 2  ;;  %s598_s7 = sshll.u32 %s1115_s30, 3 }
  0x17   : > { %s921_s10 = scalar_lea.vmem %s1102_s0, %s596_s6  ;;  %s929_s14 = scalar_lea.vmem %s1105_s3, %s598_s7 }
  0x18   : > { %v642_v0 = vld [vmem:[%s921_s10] sm:$0xff]   ;;  %v713_v4 = vld [vmem:[%s921_s10 + $0x8] sm:$0xff]   ;;  %v714_v8 = vld [vmem:[%s921_s10 + $0x10] sm:$0xff]   ;;  %s969_s8 = scalar_lea.vmem %s1107_s5, %s598_s7  ;;  %s999_s30 = scalar_lea.vmem [#allocation2], %s946_s25 }
  0x19   : > { %v643_v2 = vunpack.c.l.bf16 %v642_v0  ;;  %v644_v3 = vunpack.c.h.bf16 %v642_v0  ;;  %v647_v6 = vunpack.c.l.bf16 %v713_v4  ;;  %v648_v7 = vunpack.c.h.bf16 %v713_v4  ;;  %v420_v11 = vld [vmem:[%s929_s14] sm:$0xff]  ;;  %v715_v14 = vld [vmem:[%s921_s10 + $0x18] sm:$0xff]   ;;  %v421_v15 = vld [vmem:[%s929_s14 + $0x8] sm:$0xff]  ;;  %s487_s7 = sshll.u32 %s999_s30, 4  ;;  %s1036_s7 = int_to_ptr.vmem [resolvable:$true] %s487_s7 }
  0x1a   : > { %v651_v12 = vunpack.c.l.bf16 %v714_v8  ;;  %v652_v13 = vunpack.c.h.bf16 %v714_v8  ;;  %v422_v18 = vld [vmem:[%s929_s14 + $0x10] sm:$0xff]  ;;  %v423_v19 = vld [vmem:[%s929_s14 + $0x18] sm:$0xff]  ;;  %v655_v20 = vunpack.c.l.bf16 %v715_v14  ;;  %v656_v21 = vunpack.c.h.bf16 %v715_v14  ;;  %v424_v26 = vld [vmem:[%s929_s14 + $0x20] sm:$0xff]  ;;  %p775_p0 = scmp.lt.s32.totalorder %s1036_s7, %s773_s16 }
  0x1b   : > { %v301_v9 = vmul.f32 %v643_v2, %v935_v1  ;;  %v302_v10 = vmul.f32 %v644_v3, %v935_v1  ;;  %v303_v16 = vmul.f32 %v647_v6, %v935_v1  ;;  %v304_v17 = vmul.f32 %v648_v7, %v935_v1  ;;  %v425_v27 = vld [vmem:[%s929_s14 + $0x28] sm:$0xff]  ;;  %v716_v28 = vld [vmem:[%s921_s10 + $0x20] sm:$0xff]   ;;  %v426_v33 = vld [vmem:[%s929_s14 + $0x30] sm:$0xff] }
  0x1c   : > { %v305_v24 = vmul.f32 %v651_v12, %v935_v1  ;;  %v306_v25 = vmul.f32 %v652_v13, %v935_v1  ;;  %v307_v31 = vmul.f32 %v655_v20, %v935_v1  ;;  %v308_v32 = vmul.f32 %v656_v21, %v935_v1  ;;  %v427_v34 = vld [vmem:[%s929_s14 + $0x38] sm:$0xff]  ;;  %v428_v35 = vld [vmem:[%s929_s14 + $0x40] sm:$0xff]  ;;  %v429_v36 = vld [vmem:[%s929_s14 + $0x48] sm:$0xff] }
  0x1d   : > { %v324_v22 = vadd.f32 %v941_v5, %v301_v9  ;;  %v325_v23 = vadd.f32 %v941_v5, %v302_v10  ;;  %v326_v29 = vadd.f32 %v941_v5, %v303_v16  ;;  %v327_v30 = vadd.f32 %v941_v5, %v304_v17  ;;  %v717_v37 = vld [vmem:[%s921_s10 + $0x28] sm:$0xff]   ;;  %v430_v42 = vld [vmem:[%s929_s14 + $0x50] sm:$0xff]  ;;  %v983_v43 = vld [vmem:[%s929_s14 + $0x58] sm:$0xff] }
  0x1e   : > { %v328_v41 = vadd.f32 %v941_v5, %v305_v24  ;;  %v986_v44 = vld [vmem:[%s929_s14 + $0x60] sm:$0xff]  ;;  %v329_v48 = vadd.f32 %v941_v5, %v306_v25  ;;  %v990_v49 = vld [vmem:[%s929_s14 + $0x68] sm:$0xff]  ;;  %v993_v50 = vld [vmem:[%s929_s14 + $0x70] sm:$0xff]  ;;  %v330_v53 = vadd.f32 %v941_v5, %v307_v31  ;;  %v331_v54 = vadd.f32 %v941_v5, %v308_v32 }
  0x1f   : > { %v676_v38 = vpack.c.bf16 %v325_v23, %v324_v22  ;;  %v436_v39 = vadd.f32 %v420_v11, %v324_v22  ;;  %v437_v40 = vadd.f32 %v421_v15, %v325_v23  ;;  %v681_v45 = vpack.c.bf16 %v327_v30, %v326_v29  ;;  %v996_v51 = vld [vmem:[%s929_s14 + $0x78] sm:$0xff]  ;;  %v718_v56 = vld [vmem:[%s921_s10 + $0x30] sm:$0xff]   ;;  %s768_s14 = scalar_lea.vmem %s1036_s7, 1024 }
  0x20   : > { %v438_v46 = vadd.f32 %v422_v18, %v326_v29  ;;  %v439_v47 = vadd.f32 %v423_v19, %v327_v30  ;;  %v440_v52 = vadd.f32 %v424_v26, %v328_v41  ;;  %v659_v55 = vunpack.c.l.bf16 %v716_v28  ;;  %v719_v61 = vld [vmem:[%s921_s10 + $0x38] sm:$0xff]   ;;  %p769_p11 = scmp.ne.s32.totalorder %s1036_s7, %s768_s14  ;;  %p776_p1 = scmp.lt.s32.totalorder %s774_s17, %s768_s14 }
  0x21   : > { %677 = vst [vmem:[%s999_s30] sm:$0xff] %v676_v38   ;;  %452 = vst [vmem:[%s969_s8] sm:$0xff] %v436_v39  ;;  %v686_v57 = vpack.c.bf16 %v329_v48, %v328_v41  ;;  %v441_v58 = vadd.f32 %v425_v27, %v329_v48  ;;  %v660_v59 = vunpack.c.h.bf16 %v716_v28  ;;  %v663_v60 = vunpack.c.l.bf16 %v717_v37 }
  0x22   : > { %453 = vst [vmem:[%s969_s8 + $0x8] sm:$0xff] %v437_v40  ;;  %720 = vst [vmem:[%s999_s30 + $0x8] sm:$0xff] %v681_v45   ;;  %v691_v62 = vpack.c.bf16 %v331_v54, %v330_v53  ;;  %v442_v63 = vadd.f32 %v426_v33, %v330_v53  ;;  %v443_v0 = vadd.f32 %v427_v34, %v331_v54  ;;  %v664_v4 = vunpack.c.h.bf16 %v717_v37  ;;  %p770_p12 = pnand %p769_p11, %p903_p5  ;;  %p777_p2 = por %p776_p1, %p775_p0 }
  0x23   : > { %454 = vst [vmem:[%s969_s8 + $0x10] sm:$0xff] %v438_v46  ;;  %455 = vst [vmem:[%s969_s8 + $0x18] sm:$0xff] %v439_v47  ;;  %v309_v2 = vmul.f32 %v659_v55, %v935_v1  ;;  %v310_v3 = vmul.f32 %v660_v59, %v935_v1  ;;  %v311_v6 = vmul.f32 %v663_v60, %v935_v1  ;;  %v667_v7 = vunpack.c.l.bf16 %v718_v56 }
  0x24   : > { %456 = vst [vmem:[%s969_s8 + $0x20] sm:$0xff] %v440_v52  ;;  %721 = vst [vmem:[%s999_s30 + $0x10] sm:$0xff] %v686_v57   ;;  %v668_v9 = vunpack.c.h.bf16 %v718_v56  ;;  %v671_v10 = vunpack.c.l.bf16 %v719_v61  ;;  %v672_v11 = vunpack.c.h.bf16 %v719_v61  ;;  %v312_v13 = vmul.f32 %v664_v4, %v935_v1  ;;  %p771_p13 = pneg %p770_p12 }
  0x25   : > { %457 = vst [vmem:[%s969_s8 + $0x28] sm:$0xff] %v441_v58  ;;  %722 = vst [vmem:[%s999_s30 + $0x18] sm:$0xff] %v691_v62   ;;  %v332_v8 = vadd.f32 %v941_v5, %v309_v2  ;;  %v333_v12 = vadd.f32 %v941_v5, %v310_v3  ;;  %v334_v14 = vadd.f32 %v941_v5, %v311_v6 }
  0x26   : > { %458 = vst [vmem:[%s969_s8 + $0x30] sm:$0xff] %v442_v63  ;;  %459 = vst [vmem:[%s969_s8 + $0x38] sm:$0xff] %v443_v0  ;;  %v313_v15 = vmul.f32 %v667_v7, %v935_v1  ;;  %v314_v17 = vmul.f32 %v668_v9, %v935_v1  ;;  %v315_v18 = vmul.f32 %v671_v10, %v935_v1  ;;  %p778_p3 = pnand %p777_p2, %p771_p13 }
  0x27   : > { %v444_v16 = vadd.f32 %v428_v35, %v332_v8  ;;  %v316_v19 = vmul.f32 %v672_v11, %v935_v1  ;;  %v696_v20 = vpack.c.bf16 %v333_v12, %v332_v8  ;;  %v445_v21 = vadd.f32 %v429_v36, %v333_v12 }
  0x28   : > { %v335_v22 = vadd.f32 %v941_v5, %v312_v13  ;;  %v446_v23 = vadd.f32 %v430_v42, %v334_v14  ;;  %v336_v24 = vadd.f32 %v941_v5, %v313_v15  ;;  %v337_v25 = vadd.f32 %v941_v5, %v314_v17 }
  0x29   : > { %v338_v26 = vadd.f32 %v941_v5, %v315_v18  ;;  %v339_v27 = vadd.f32 %v941_v5, %v316_v19  ;;  %460 = vst [vmem:[%s969_s8 + $0x40] sm:$0xff] %v444_v16  ;;  %723 = vst [vmem:[%s999_s30 + $0x20] sm:$0xff] %v696_v20  }
  0x2a   : > { %v701_v1 = vpack.c.bf16 %v335_v22, %v334_v14  ;;  %v447_v28 = vadd.f32 %v983_v43, %v335_v22  ;;  %461 = vst [vmem:[%s969_s8 + $0x48] sm:$0xff] %v445_v21  ;;  %462 = vst [vmem:[%s969_s8 + $0x50] sm:$0xff] %v446_v23  ;;  %v706_v5 = vpack.c.bf16 %v337_v25, %v336_v24 }
  0x2b   : > { %v448_v29 = vadd.f32 %v986_v44, %v336_v24  ;;  %v449_v30 = vadd.f32 %v990_v49, %v337_v25  ;;  %v711_v31 = vpack.c.bf16 %v339_v27, %v338_v26  ;;  %v450_v32 = vadd.f32 %v993_v50, %v338_v26 }
  0x2c   : > { %724 = vst [vmem:[%s999_s30 + $0x28] sm:$0xff] %v701_v1   ;;  %v451_v33 = vadd.f32 %v996_v51, %v339_v27  ;;  %463 = vst [vmem:[%s969_s8 + $0x58] sm:$0xff] %v447_v28 }
  0x2d   : > { %725 = vst [vmem:[%s999_s30 + $0x30] sm:$0xff] %v706_v5   ;;  %726 = vst [vmem:[%s999_s30 + $0x38] sm:$0xff] %v711_v31  }
  0x2e   : > { %464 = vst [vmem:[%s969_s8 + $0x60] sm:$0xff] %v448_v29  ;;  %465 = vst [vmem:[%s969_s8 + $0x68] sm:$0xff] %v449_v30 }
  0x2f   : > { %466 = vst [vmem:[%s969_s8 + $0x70] sm:$0xff] %v450_v32  ;;  %467 = vst [vmem:[%s969_s8 + $0x78] sm:$0xff] %v451_v33 }
  0x30   : > { %781 = shalt.err (!%p778_p3)
}
  0x31   : > { %s782_s11 = scalar_lea.hbm %s1045_s12, 1024  ;;  %s786_s26 = scalar_lea.hbm %s1106_s4, 2048 }
  0x32   : > { %p783_p4 = scmp.ne.s32.totalorder %s1045_s12, %s782_s11  ;;  %p787_p9 = scmp.lt.u32.totalorder %s1045_s12, %s1106_s4 }
  0x33   : > { %p788_p10 = scmp.lt.u32.totalorder %s786_s26, %s782_s11  ;;  %p790_p12 = scmp.lt.u32.totalorder %s782_s11, %s1045_s12 }
  0x34   : > { %p784_p7 = pnand %p783_p4, %p903_p5 }
  0x35   : > { %p789_p11 = por %p788_p10, %p787_p9 }
  0x36   : > { %p785_p8 = pneg %p784_p7 }
  0x37   : > { %p791_p13 = por %p790_p12, %p789_p11 }
  0x39   : > { %p792_p0 = pnand %p791_p13, %p785_p8 }
  0x3b   : > { %795 = shalt.err (!%p792_p0)
}
  0x3c   : > { %s833_s30 = smov 64   ;;  %s834_s9 = smov 4  }
  0x3d   : > { %727 = dma.vmem_to_hbm [thread:$0]  (%p903_p5), %s1036_s7, 1024, %s1045_s12, %s1061_s13, %s833_s30, %s833_s30, %s834_s9  }
  0x3e PF: > { %p733_p1 = scmp.ge.s32.totalorder %s830_s21, 2  ;;  %s506_s22 = sand.u32 1, %s818_s18  }
  0x3f   : > { %s507_s10 = scalar_lea.sflag [#allocation3], %s506_s22 }
  0x40   : > { %p730_p2 = pnand %p733_p1, %p907_p6 }
  0x42   : > { %813 = dma.done.wait (!%p730_p2), %s507_s10, 1024  }
  0x43   : > { %815 = vsyncadd (!%p730_p2), %s507_s10, 4294966272  ;;  %p16_p3 = scmp.ge.s32.totalorder %s890_s24, 4   ;;  %s1110_s18 = smov %s822_s19 }
  0x44   : > { %s1111_s19 = smov %s826_s20  ;;  %s1112_s20 = smov %s901_s27 }
  0x45   : > { %s1113_s21 = smov %s890_s24  ;;  %18 = sbr.rel (!%p16_p3) target bundleno = 3 (0x3), region = 86 }
  0x4c   :  { %520 = vsyncpa [#allocation3], 1 }
  0x4d   :  { %522 = vsyncpa [#allocation3 + $0x1], 1 }

</bundles_post_ra>
